<compile_context>
chip_gen: v7x
topology: tpu7x:2x2x1
jax: 0.10.0
libtpu: 0.0.40
codegen_flags: <defaults>
</compile_context>

<pallas_src>
import jax
import jax.numpy as jnp
import numpy as np
from jax.experimental import pallas as pl
from jax.experimental.pallas import tpu as pltpu


# ----------------------------- fused Pallas kernel -----------------------------

def _mnist_fused_kernel(x_ref, m1_ref, m2_ref, w3_ref, w4_ref,
                        b1_ref, b2_ref, b3_ref, b4_ref,
                        out_ref, t1e_ref, t1o_ref, t2_ref):
    """Whole MNISTNet forward for one batch tile, entirely in VMEM.

    x_ref : [4, 7, bt, 28]  input rows split by (row mod 4); x_ref[m, r, b, :] = img[b, 4r+m, :]
    m1_ref: [6, 28, 120]    banded weights of fused conv1+pool (columns = (px, c10))
    m2_ref: [6, 120, 80]    banded weights of fused conv2+pool (columns = (qx, c20))
    w3_ref: [4, 80, 50]     Linear(320,50) weight, NCHW-flatten permutation folded in
    w4_ref: [50, 10]        Linear(50,10) weight (transposed)
    out_ref:[bt, 10]        log-softmax logits
    t1e/t1o: [6*bt, 120]    pooled+tanh conv1 activations, even / odd pooled rows, rows=(r,b)
    t2     : [4*bt, 80]     pooled conv2 pre-activations, rows=(qy,b)
    """
    bt = out_ref.shape[0]

    def mm(a, b):
        return jnp.dot(a, b, preferred_element_type=jnp.float32)

    def slab(m, s):
        # image rows 4*(s+r)+m for r=0..5, laid out as rows (r, b) -> [6*bt, 28]
        return x_ref[m, s:s + 6, :, :].reshape(6 * bt, 28)

    # ---- Stage 1: Conv2d(1,10,5) + AvgPool2d(2,2) + Tanh --------------------
    # fused 6x6 stride-2 conv; even pooled rows (py=2r) and odd pooled rows (py=2r+1)
    e_taps = ((0, 0), (1, 0), (2, 0), (3, 0), (0, 1), (1, 1))   # (m, s) for tap a=0..5
    o_taps = ((2, 0), (3, 0), (0, 1), (1, 1), (2, 1), (3, 1))
    for a, (m, s) in enumerate(e_taps):
        c = mm(slab(m, s), m1_ref[a])
        if a == 0:
            t1e_ref[...] = c
        else:
            t1e_ref[...] += c
    for a, (m, s) in enumerate(o_taps):
        c = mm(slab(m, s), m1_ref[a])
        if a == 0:
            t1o_ref[...] = c
        else:
            t1o_ref[...] += c
    t1e_ref[...] = jnp.tanh(t1e_ref[...] + b1_ref[...])
    t1o_ref[...] = jnp.tanh(t1o_ref[...] + b1_ref[...])

    # ---- Stage 2: Conv2d(10,20,5) + Dropout2d(identity) + AvgPool2d + Tanh --
    taps2 = ((t1e_ref, 0), (t1o_ref, 0), (t1e_ref, 1),
             (t1o_ref, 1), (t1e_ref, 2), (t1o_ref, 2))          # tap a=0..5
    for a, (src, s) in enumerate(taps2):
        c = mm(src[s * bt:(s + 4) * bt, :], m2_ref[a])
        if a == 0:
            t2_ref[...] = c
        else:
            t2_ref[...] += c
    t2 = jnp.tanh(t2_ref[...] + b2_ref[...])                    # [4*bt, 80]

    # ---- Stage 3: Flatten(NCHW, folded into w3) -> Linear(320,50) -> Tanh
    #               -> Dropout2d(identity) -> Linear(50,10) -> log_softmax ----
    h = mm(t2[0:bt, :], w3_ref[0])
    for qy in range(1, 4):
        h = h + mm(t2[qy * bt:(qy + 1) * bt, :], w3_ref[qy])
    h = jnp.tanh(h + b3_ref[...])                               # [bt, 50]

    y = mm(h, w4_ref[...]) + b4_ref[...]                        # [bt, 10]
    z = y - jnp.max(y, axis=-1, keepdims=True)
    out_ref[...] = z - jnp.log(jnp.sum(jnp.exp(z), axis=-1, keepdims=True))


# ----------------------------- host-side wrapper --------------------------------

def _pick_block_b(B):
    for cand in (64, 32, 16, 8):
        if B >= cand:
            return cand
    return 8


def mnist_net_forward(x_nchw, kparams):
    B = x_nchw.shape[0]
    assert x_nchw.shape[1:] == (1, 28, 28)
    block_b = _pick_block_b(B)
    B_pad = -(-B // block_b) * block_b

    x = x_nchw.reshape(B, 28, 28).astype(jnp.float32)
    if B_pad != B:
        x = jnp.pad(x, ((0, B_pad - B), (0, 0), (0, 0)))
    # split the raw image rows by (row mod 4): x_par[m, r, b, :] = x[b, 4r+m, :]
    x_par = jnp.stack(
        [jnp.transpose(x[:, m::4, :], (1, 0, 2)) for m in range(4)], axis=0)

    grid = (B_pad // block_b,)

    per_sample_flops = 2 * (12 * 6 * 28 * 120 + 6 * 4 * 120 * 80 + 4 * 80 * 50 + 50 * 10)
    per_sample_trans = 2 * 6 * 120 + 4 * 80 + 50 + 11
    cost = pl.CostEstimate(
        flops=int(B_pad * per_sample_flops),
        transcendentals=int(B_pad * per_sample_trans),
        bytes_accessed=int(B_pad * (4 * 7 * 28 + 10) * 4 + 400_000),
    )

    out = pl.pallas_call(
        _mnist_fused_kernel,
        out_shape=jax.ShapeDtypeStruct((B_pad, 10), jnp.float32),
        grid_spec=pltpu.PrefetchScalarGridSpec(
            num_scalar_prefetch=0,
            grid=grid,
            in_specs=[
                pl.BlockSpec((4, 7, block_b, 28), lambda i: (0, 0, i, 0)),  # input
                pl.BlockSpec((6, 28, 120), lambda i: (0, 0, 0)),            # m1 (resident)
                pl.BlockSpec((6, 120, 80), lambda i: (0, 0, 0)),            # m2 (resident)
                pl.BlockSpec((4, 80, 50), lambda i: (0, 0, 0)),             # w3 (resident)
                pl.BlockSpec((50, 10), lambda i: (0, 0)),                   # w4 (resident)
                pl.BlockSpec((1, 120), lambda i: (0, 0)),                   # b1 tiled
                pl.BlockSpec((1, 80), lambda i: (0, 0)),                    # b2 tiled
                pl.BlockSpec((1, 50), lambda i: (0, 0)),                    # b3
                pl.BlockSpec((1, 10), lambda i: (0, 0)),                    # b4
            ],
            out_specs=pl.BlockSpec((block_b, 10), lambda i: (i, 0)),
            scratch_shapes=[
                pltpu.VMEM((6 * block_b, 120), jnp.float32),   # t1 even pooled rows
                pltpu.VMEM((6 * block_b, 120), jnp.float32),   # t1 odd pooled rows
                pltpu.VMEM((4 * block_b, 80), jnp.float32),    # t2 accumulator
            ],
        ),
        compiler_params=pltpu.CompilerParams(
            dimension_semantics=("parallel",),
            vmem_limit_bytes=32 * 1024 * 1024,
        ),
        cost_estimate=cost,
    )(x_par, kparams["m1"], kparams["m2"], kparams["w3p"], kparams["w4t"],
      kparams["b1t"], kparams["b2t"], kparams["b3r"], kparams["b4r"])

    return out[:B]


# -------------------- one-time weight preprocessing (host side) ------------------

def _fuse_conv_pool(w):
    """PyTorch conv weight [Cout,Cin,5,5] -> 6x6 stride-2 kernel [6,6,Cin,Cout]
    equal to (conv k=5, stride 1) followed by AvgPool2d(2,2)."""
    wt = np.transpose(np.asarray(w, np.float32), (2, 3, 1, 0))   # [ki,kj,Cin,Cout]
    Cin, Cout = wt.shape[2], wt.shape[3]
    w6 = np.zeros((6, 6, Cin, Cout), np.float32)
    for dy in range(2):
        for dx in range(2):
            w6[dy:dy + 5, dx:dx + 5, :, :] += 0.25 * wt
    return w6


def _band_matrix(w6, in_width, out_width):
    """Banded GEMM weight M[a, j*Cin+ci, x*Cout+co] = w6[a, j-2x, ci, co] (0<=j-2x<6)."""
    Cin, Cout = w6.shape[2], w6.shape[3]
    M = np.zeros((6, in_width * Cin, out_width * Cout), np.float32)
    for a in range(6):
        for x in range(out_width):
            for kk in range(6):
                j = 2 * x + kk
                M[a, j * Cin:(j + 1) * Cin, x * Cout:(x + 1) * Cout] = w6[a, kk]
    return M


def pack_params(raw):
    w1 = np.asarray(raw["w1"]); b1 = np.asarray(raw["b1"])
    w2 = np.asarray(raw["w2"]); b2 = np.asarray(raw["b2"])
    w3 = np.asarray(raw["w3"]); b3 = np.asarray(raw["b3"])
    w4 = np.asarray(raw["w4"]); b4 = np.asarray(raw["b4"])

    m1 = _band_matrix(_fuse_conv_pool(w1), 28, 12)   # [6, 28, 120]
    m2 = _band_matrix(_fuse_conv_pool(w2), 12, 4)    # [6, 120, 80]

    # Linear(320,50) with PyTorch's NCHW flatten (f = co*16 + qy*4 + qx) folded in;
    # kernel feature order for row-block qy is (qx, co).
    w3p = np.zeros((4, 80, 50), np.float32)
    for qy in range(4):
        for qx in range(4):
            for co in range(20):
                w3p[qy, qx * 20 + co, :] = w3[:, co * 16 + qy * 4 + qx]

    return {
        "m1": jnp.asarray(m1),
        "m2": jnp.asarray(m2),
        "w3p": jnp.asarray(w3p),
        "w4t": jnp.asarray(w4.T),                       # [50, 10]
        "b1t": jnp.asarray(np.tile(b1, 12)[None, :]),   # [1, 120]
        "b2t": jnp.asarray(np.tile(b2, 4)[None, :]),    # [1, 80]
        "b3r": jnp.asarray(b3[None, :]),                # [1, 50]
        "b4r": jnp.asarray(b4[None, :]),                # [1, 10]
    }


def init_params(key):
    ks = jax.random.split(key, 8)
    raw = {
        "w1": jax.random.normal(ks[0], (10, 1, 5, 5), jnp.float32) * 0.10,
        "b1": jax.random.normal(ks[1], (10,), jnp.float32) * 0.10,
        "w2": jax.random.normal(ks[2], (20, 10, 5, 5), jnp.float32) * 0.05,
        "b2": jax.random.normal(ks[3], (20,), jnp.float32) * 0.05,
        "w3": jax.random.normal(ks[4], (50, 320), jnp.float32) * 0.05,
        "b3": jax.random.normal(ks[5], (50,), jnp.float32) * 0.05,
        "w4": jax.random.normal(ks[6], (10, 50), jnp.float32) * 0.10,
        "b4": jax.random.normal(ks[7], (10,), jnp.float32) * 0.10,
    }
    return raw, pack_params(raw)


# -------------------------- plain-XLA reference (for check) ----------------------

def _reference_forward(x_nchw, raw):
    dn = ("NCHW", "OIHW", "NCHW")
    hp = jax.lax.Precision.HIGHEST
    y = jax.lax.conv_general_dilated(x_nchw.astype(jnp.float32), raw["w1"], (1, 1),
                                     "VALID", dimension_numbers=dn, precision=hp)
    y = y + raw["b1"][None, :, None, None]
    y = jax.lax.reduce_window(y, 0.0, jax.lax.add, (1, 1, 2, 2), (1, 1, 2, 2), "VALID") * 0.25
    y = jnp.tanh(y)
    y = jax.lax.conv_general_dilated(y, raw["w2"], (1, 1), "VALID",
                                     dimension_numbers=dn, precision=hp)
    y = y + raw["b2"][None, :, None, None]
    y = jax.lax.reduce_window(y, 0.0, jax.lax.add, (1, 1, 2, 2), (1, 1, 2, 2), "VALID") * 0.25
    y = jnp.tanh(y)
    y = y.reshape(y.shape[0], -1)                      # NCHW flatten -> [B, 320]
    y = jnp.tanh(y @ raw["w3"].T + raw["b3"])
    y = y @ raw["w4"].T + raw["b4"]
    return jax.nn.log_softmax(y, axis=-1)


if __name__ == "__main__":
    key = jax.random.PRNGKey(0)
    pkey, xkey = jax.random.split(key)
    raw, kparams = init_params(pkey)

    # MNIST-shaped input (28x28 is required by Flatten -> Linear(320, 50)).
    x = jax.random.normal(xkey, (2, 1, 28, 28), jnp.float32)

    out = jax.jit(mnist_net_forward)(x, kparams)
    out = jax.block_until_ready(out)

    assert out.shape == (2, 10) and out.dtype == jnp.float32
    # log_softmax rows must exponentiate-sum to 1
    assert bool(jnp.all(jnp.abs(jnp.exp(out).sum(axis=-1) - 1.0) < 1e-3))
    # cross-check against a plain-XLA implementation of the PyTorch net (eval mode)
    ref = _reference_forward(x, raw)
    assert bool(jnp.max(jnp.abs(out - ref)) < 5e-2)

    print("KERNEL_OK")
</pallas_src>

<mosaic_0001>
module attributes {stable_mosaic.version = 11 : i64} {
  func.func @_mnist_fused_kernel(%arg0: i32, %arg1: memref<4x7x8x28xf32, #tpu.memory_space<vmem>>, %arg2: memref<6x28x120xf32, #tpu.memory_space<vmem>>, %arg3: memref<6x120x80xf32, #tpu.memory_space<vmem>>, %arg4: memref<4x80x50xf32, #tpu.memory_space<vmem>>, %arg5: memref<50x10xf32, #tpu.memory_space<vmem>>, %arg6: memref<1x120xf32, #tpu.memory_space<vmem>>, %arg7: memref<1x80xf32, #tpu.memory_space<vmem>>, %arg8: memref<1x50xf32, #tpu.memory_space<vmem>>, %arg9: memref<1x10xf32, #tpu.memory_space<vmem>>, %arg10: memref<8x10xf32, #tpu.memory_space<vmem>>, %arg11: memref<48x120xf32, #tpu.memory_space<vmem>>, %arg12: memref<48x120xf32, #tpu.memory_space<vmem>>, %arg13: memref<32x80xf32, #tpu.memory_space<vmem>>) attributes {dimension_semantics = [#tpu.dimension_semantics<parallel>], iteration_bounds = array<i64: 1>, scalar_prefetch = 0 : i64, scratch_operands = 3 : i64, tpu.core_type = #tpu.core_type<tc>, window_params = [{transform_indices = @transform_0, window_bounds = array<i64: 4, 7, 8, 28>}, {pipeline_mode = #tpu.pipeline_mode<synchronous>, transform_indices = @transform_1, window_bounds = array<i64: 6, 28, 120>}, {pipeline_mode = #tpu.pipeline_mode<synchronous>, transform_indices = @transform_2, window_bounds = array<i64: 6, 120, 80>}, {pipeline_mode = #tpu.pipeline_mode<synchronous>, transform_indices = @transform_3, window_bounds = array<i64: 4, 80, 50>}, {pipeline_mode = #tpu.pipeline_mode<synchronous>, transform_indices = @transform_4, window_bounds = array<i64: 50, 10>}, {pipeline_mode = #tpu.pipeline_mode<synchronous>, transform_indices = @transform_5, window_bounds = array<i64: 1, 120>}, {pipeline_mode = #tpu.pipeline_mode<synchronous>, transform_indices = @transform_6, window_bounds = array<i64: 1, 80>}, {pipeline_mode = #tpu.pipeline_mode<synchronous>, transform_indices = @transform_7, window_bounds = array<i64: 1, 50>}, {pipeline_mode = #tpu.pipeline_mode<synchronous>, transform_indices = @transform_8, window_bounds = array<i64: 1, 10>}, {transform_indices = @transform_9, window_bounds = array<i64: 8, 10>}]} {
    %c0 = arith.constant 0 : index
    %c0_0 = arith.constant 0 : index
    %c0_1 = arith.constant 0 : index
    %c0_2 = arith.constant 0 : index
    %0 = vector.load %arg1[%c0, %c0_0, %c0_1, %c0_2] : memref<4x7x8x28xf32, #tpu.memory_space<vmem>>, vector<1x6x8x28xf32>
    %1 = vector.shape_cast %0 : vector<1x6x8x28xf32> to vector<6x8x28xf32>
    %2 = vector.shape_cast %1 : vector<6x8x28xf32> to vector<48x28xf32>
    %c0_3 = arith.constant 0 : index
    %c0_4 = arith.constant 0 : index
    %c0_5 = arith.constant 0 : index
    %3 = vector.load %arg2[%c0_3, %c0_4, %c0_5] : memref<6x28x120xf32, #tpu.memory_space<vmem>>, vector<1x28x120xf32>
    %4 = vector.shape_cast %3 : vector<1x28x120xf32> to vector<28x120xf32>
    %cst = arith.constant dense<0.000000e+00> : vector<48x120xf32>
    %5 = tpu.matmul %2, %4, %cst {dimension_numbers = #tpu.dot_dimension_numbers<[1], [0], [0], [1], [0, 0, 1, 1], [], []>} : vector<48x28xf32>, vector<28x120xf32>, vector<48x120xf32> -> vector<48x120xf32>
    %c0_6 = arith.constant 0 : index
    %c0_7 = arith.constant 0 : index
    %6 = vector.load %arg11[%c0_6, %c0_7] : memref<48x120xf32, #tpu.memory_space<vmem>>, vector<48x120xf32>
    tpu.vector_store %arg11[%c0_6, %c0_7], %5 {strides = array<i32>} : memref<48x120xf32, #tpu.memory_space<vmem>>, vector<48x120xf32>,
    %c1 = arith.constant 1 : index
    %c0_8 = arith.constant 0 : index
    %c0_9 = arith.constant 0 : index
    %c0_10 = arith.constant 0 : index
    %7 = vector.load %arg1[%c1, %c0_8, %c0_9, %c0_10] : memref<4x7x8x28xf32, #tpu.memory_space<vmem>>, vector<1x6x8x28xf32>
    %8 = vector.shape_cast %7 : vector<1x6x8x28xf32> to vector<6x8x28xf32>
    %9 = vector.shape_cast %8 : vector<6x8x28xf32> to vector<48x28xf32>
    %c1_11 = arith.constant 1 : index
    %c0_12 = arith.constant 0 : index
    %c0_13 = arith.constant 0 : index
    %10 = vector.load %arg2[%c1_11, %c0_12, %c0_13] : memref<6x28x120xf32, #tpu.memory_space<vmem>>, vector<1x28x120xf32>
    %11 = vector.shape_cast %10 : vector<1x28x120xf32> to vector<28x120xf32>
    %cst_14 = arith.constant dense<0.000000e+00> : vector<48x120xf32>
    %12 = tpu.matmul %9, %11, %cst_14 {dimension_numbers = #tpu.dot_dimension_numbers<[1], [0], [0], [1], [0, 0, 1, 1], [], []>} : vector<48x28xf32>, vector<28x120xf32>, vector<48x120xf32> -> vector<48x120xf32>
    %c0_15 = arith.constant 0 : index
    %c0_16 = arith.constant 0 : index
    %13 = vector.load %arg11[%c0_15, %c0_16] : memref<48x120xf32, #tpu.memory_space<vmem>>, vector<48x120xf32>
    %14 = arith.addf %13, %12 : vector<48x120xf32>
    %c0_17 = arith.constant 0 : index
    %c0_18 = arith.constant 0 : index
    %15 = vector.load %arg11[%c0_17, %c0_18] : memref<48x120xf32, #tpu.memory_space<vmem>>, vector<48x120xf32>
    tpu.vector_store %arg11[%c0_17, %c0_18], %14 {strides = array<i32>} : memref<48x120xf32, #tpu.memory_space<vmem>>, vector<48x120xf32>,
    %c2 = arith.constant 2 : index
    %c0_19 = arith.constant 0 : index
    %c0_20 = arith.constant 0 : index
    %c0_21 = arith.constant 0 : index
    %16 = vector.load %arg1[%c2, %c0_19, %c0_20, %c0_21] : memref<4x7x8x28xf32, #tpu.memory_space<vmem>>, vector<1x6x8x28xf32>
    %17 = vector.shape_cast %16 : vector<1x6x8x28xf32> to vector<6x8x28xf32>
    %18 = vector.shape_cast %17 : vector<6x8x28xf32> to vector<48x28xf32>
    %c2_22 = arith.constant 2 : index
    %c0_23 = arith.constant 0 : index
    %c0_24 = arith.constant 0 : index
    %19 = vector.load %arg2[%c2_22, %c0_23, %c0_24] : memref<6x28x120xf32, #tpu.memory_space<vmem>>, vector<1x28x120xf32>
    %20 = vector.shape_cast %19 : vector<1x28x120xf32> to vector<28x120xf32>
    %cst_25 = arith.constant dense<0.000000e+00> : vector<48x120xf32>
    %21 = tpu.matmul %18, %20, %cst_25 {dimension_numbers = #tpu.dot_dimension_numbers<[1], [0], [0], [1], [0, 0, 1, 1], [], []>} : vector<48x28xf32>, vector<28x120xf32>, vector<48x120xf32> -> vector<48x120xf32>
    %c0_26 = arith.constant 0 : index
    %c0_27 = arith.constant 0 : index
    %22 = vector.load %arg11[%c0_26, %c0_27] : memref<48x120xf32, #tpu.memory_space<vmem>>, vector<48x120xf32>
    %23 = arith.addf %22, %21 : vector<48x120xf32>
    %c0_28 = arith.constant 0 : index
    %c0_29 = arith.constant 0 : index
    %24 = vector.load %arg11[%c0_28, %c0_29] : memref<48x120xf32, #tpu.memory_space<vmem>>, vector<48x120xf32>
    tpu.vector_store %arg11[%c0_28, %c0_29], %23 {strides = array<i32>} : memref<48x120xf32, #tpu.memory_space<vmem>>, vector<48x120xf32>,
    %c3 = arith.constant 3 : index
    %c0_30 = arith.constant 0 : index
    %c0_31 = arith.constant 0 : index
    %c0_32 = arith.constant 0 : index
    %25 = vector.load %arg1[%c3, %c0_30, %c0_31, %c0_32] : memref<4x7x8x28xf32, #tpu.memory_space<vmem>>, vector<1x6x8x28xf32>
    %26 = vector.shape_cast %25 : vector<1x6x8x28xf32> to vector<6x8x28xf32>
    %27 = vector.shape_cast %26 : vector<6x8x28xf32> to vector<48x28xf32>
    %c3_33 = arith.constant 3 : index
    %c0_34 = arith.constant 0 : index
    %c0_35 = arith.constant 0 : index
    %28 = vector.load %arg2[%c3_33, %c0_34, %c0_35] : memref<6x28x120xf32, #tpu.memory_space<vmem>>, vector<1x28x120xf32>
    %29 = vector.shape_cast %28 : vector<1x28x120xf32> to vector<28x120xf32>
    %cst_36 = arith.constant dense<0.000000e+00> : vector<48x120xf32>
    %30 = tpu.matmul %27, %29, %cst_36 {dimension_numbers = #tpu.dot_dimension_numbers<[1], [0], [0], [1], [0, 0, 1, 1], [], []>} : vector<48x28xf32>, vector<28x120xf32>, vector<48x120xf32> -> vector<48x120xf32>
    %c0_37 = arith.constant 0 : index
    %c0_38 = arith.constant 0 : index
    %31 = vector.load %arg11[%c0_37, %c0_38] : memref<48x120xf32, #tpu.memory_space<vmem>>, vector<48x120xf32>
    %32 = arith.addf %31, %30 : vector<48x120xf32>
    %c0_39 = arith.constant 0 : index
    %c0_40 = arith.constant 0 : index
    %33 = vector.load %arg11[%c0_39, %c0_40] : memref<48x120xf32, #tpu.memory_space<vmem>>, vector<48x120xf32>
    tpu.vector_store %arg11[%c0_39, %c0_40], %32 {strides = array<i32>} : memref<48x120xf32, #tpu.memory_space<vmem>>, vector<48x120xf32>,
    %c0_41 = arith.constant 0 : index
    %c1_42 = arith.constant 1 : index
    %c0_43 = arith.constant 0 : index
    %c0_44 = arith.constant 0 : index
    %34 = vector.load %arg1[%c0_41, %c1_42, %c0_43, %c0_44] : memref<4x7x8x28xf32, #tpu.memory_space<vmem>>, vector<1x6x8x28xf32>
    %35 = vector.shape_cast %34 : vector<1x6x8x28xf32> to vector<6x8x28xf32>
    %36 = vector.shape_cast %35 : vector<6x8x28xf32> to vector<48x28xf32>
    %c4 = arith.constant 4 : index
    %c0_45 = arith.constant 0 : index
    %c0_46 = arith.constant 0 : index
    %37 = vector.load %arg2[%c4, %c0_45, %c0_46] : memref<6x28x120xf32, #tpu.memory_space<vmem>>, vector<1x28x120xf32>
    %38 = vector.shape_cast %37 : vector<1x28x120xf32> to vector<28x120xf32>
    %cst_47 = arith.constant dense<0.000000e+00> : vector<48x120xf32>
    %39 = tpu.matmul %36, %38, %cst_47 {dimension_numbers = #tpu.dot_dimension_numbers<[1], [0], [0], [1], [0, 0, 1, 1], [], []>} : vector<48x28xf32>, vector<28x120xf32>, vector<48x120xf32> -> vector<48x120xf32>
    %c0_48 = arith.constant 0 : index
    %c0_49 = arith.constant 0 : index
    %40 = vector.load %arg11[%c0_48, %c0_49] : memref<48x120xf32, #tpu.memory_space<vmem>>, vector<48x120xf32>
    %41 = arith.addf %40, %39 : vector<48x120xf32>
    %c0_50 = arith.constant 0 : index
    %c0_51 = arith.constant 0 : index
    %42 = vector.load %arg11[%c0_50, %c0_51] : memref<48x120xf32, #tpu.memory_space<vmem>>, vector<48x120xf32>
    tpu.vector_store %arg11[%c0_50, %c0_51], %41 {strides = array<i32>} : memref<48x120xf32, #tpu.memory_space<vmem>>, vector<48x120xf32>,
    %c1_52 = arith.constant 1 : index
    %c1_53 = arith.constant 1 : index
    %c0_54 = arith.constant 0 : index
    %c0_55 = arith.constant 0 : index
    %43 = vector.load %arg1[%c1_52, %c1_53, %c0_54, %c0_55] : memref<4x7x8x28xf32, #tpu.memory_space<vmem>>, vector<1x6x8x28xf32>
    %44 = vector.shape_cast %43 : vector<1x6x8x28xf32> to vector<6x8x28xf32>
    %45 = vector.shape_cast %44 : vector<6x8x28xf32> to vector<48x28xf32>
    %c5 = arith.constant 5 : index
    %c0_56 = arith.constant 0 : index
    %c0_57 = arith.constant 0 : index
    %46 = vector.load %arg2[%c5, %c0_56, %c0_57] : memref<6x28x120xf32, #tpu.memory_space<vmem>>, vector<1x28x120xf32>
    %47 = vector.shape_cast %46 : vector<1x28x120xf32> to vector<28x120xf32>
    %cst_58 = arith.constant dense<0.000000e+00> : vector<48x120xf32>
    %48 = tpu.matmul %45, %47, %cst_58 {dimension_numbers = #tpu.dot_dimension_numbers<[1], [0], [0], [1], [0, 0, 1, 1], [], []>} : vector<48x28xf32>, vector<28x120xf32>, vector<48x120xf32> -> vector<48x120xf32>
    %c0_59 = arith.constant 0 : index
    %c0_60 = arith.constant 0 : index
    %49 = vector.load %arg11[%c0_59, %c0_60] : memref<48x120xf32, #tpu.memory_space<vmem>>, vector<48x120xf32>
    %50 = arith.addf %49, %48 : vector<48x120xf32>
    %c0_61 = arith.constant 0 : index
    %c0_62 = arith.constant 0 : index
    %51 = vector.load %arg11[%c0_61, %c0_62] : memref<48x120xf32, #tpu.memory_space<vmem>>, vector<48x120xf32>
    tpu.vector_store %arg11[%c0_61, %c0_62], %50 {strides = array<i32>} : memref<48x120xf32, #tpu.memory_space<vmem>>, vector<48x120xf32>,
    %c2_63 = arith.constant 2 : index
    %c0_64 = arith.constant 0 : index
    %c0_65 = arith.constant 0 : index
    %c0_66 = arith.constant 0 : index
    %52 = vector.load %arg1[%c2_63, %c0_64, %c0_65, %c0_66] : memref<4x7x8x28xf32, #tpu.memory_space<vmem>>, vector<1x6x8x28xf32>
    %53 = vector.shape_cast %52 : vector<1x6x8x28xf32> to vector<6x8x28xf32>
    %54 = vector.shape_cast %53 : vector<6x8x28xf32> to vector<48x28xf32>
    %c0_67 = arith.constant 0 : index
    %c0_68 = arith.constant 0 : index
    %c0_69 = arith.constant 0 : index
    %55 = vector.load %arg2[%c0_67, %c0_68, %c0_69] : memref<6x28x120xf32, #tpu.memory_space<vmem>>, vector<1x28x120xf32>
    %56 = vector.shape_cast %55 : vector<1x28x120xf32> to vector<28x120xf32>
    %cst_70 = arith.constant dense<0.000000e+00> : vector<48x120xf32>
    %57 = tpu.matmul %54, %56, %cst_70 {dimension_numbers = #tpu.dot_dimension_numbers<[1], [0], [0], [1], [0, 0, 1, 1], [], []>} : vector<48x28xf32>, vector<28x120xf32>, vector<48x120xf32> -> vector<48x120xf32>
    %c0_71 = arith.constant 0 : index
    %c0_72 = arith.constant 0 : index
    %58 = vector.load %arg12[%c0_71, %c0_72] : memref<48x120xf32, #tpu.memory_space<vmem>>, vector<48x120xf32>
    tpu.vector_store %arg12[%c0_71, %c0_72], %57 {strides = array<i32>} : memref<48x120xf32, #tpu.memory_space<vmem>>, vector<48x120xf32>,
    %c3_73 = arith.constant 3 : index
    %c0_74 = arith.constant 0 : index
    %c0_75 = arith.constant 0 : index
    %c0_76 = arith.constant 0 : index
    %59 = vector.load %arg1[%c3_73, %c0_74, %c0_75, %c0_76] : memref<4x7x8x28xf32, #tpu.memory_space<vmem>>, vector<1x6x8x28xf32>
    %60 = vector.shape_cast %59 : vector<1x6x8x28xf32> to vector<6x8x28xf32>
    %61 = vector.shape_cast %60 : vector<6x8x28xf32> to vector<48x28xf32>
    %c1_77 = arith.constant 1 : index
    %c0_78 = arith.constant 0 : index
    %c0_79 = arith.constant 0 : index
    %62 = vector.load %arg2[%c1_77, %c0_78, %c0_79] : memref<6x28x120xf32, #tpu.memory_space<vmem>>, vector<1x28x120xf32>
    %63 = vector.shape_cast %62 : vector<1x28x120xf32> to vector<28x120xf32>
    %cst_80 = arith.constant dense<0.000000e+00> : vector<48x120xf32>
    %64 = tpu.matmul %61, %63, %cst_80 {dimension_numbers = #tpu.dot_dimension_numbers<[1], [0], [0], [1], [0, 0, 1, 1], [], []>} : vector<48x28xf32>, vector<28x120xf32>, vector<48x120xf32> -> vector<48x120xf32>
    %c0_81 = arith.constant 0 : index
    %c0_82 = arith.constant 0 : index
    %65 = vector.load %arg12[%c0_81, %c0_82] : memref<48x120xf32, #tpu.memory_space<vmem>>, vector<48x120xf32>
    %66 = arith.addf %65, %64 : vector<48x120xf32>
    %c0_83 = arith.constant 0 : index
    %c0_84 = arith.constant 0 : index
    %67 = vector.load %arg12[%c0_83, %c0_84] : memref<48x120xf32, #tpu.memory_space<vmem>>, vector<48x120xf32>
    tpu.vector_store %arg12[%c0_83, %c0_84], %66 {strides = array<i32>} : memref<48x120xf32, #tpu.memory_space<vmem>>, vector<48x120xf32>,
    %c0_85 = arith.constant 0 : index
    %c1_86 = arith.constant 1 : index
    %c0_87 = arith.constant 0 : index
    %c0_88 = arith.constant 0 : index
    %68 = vector.load %arg1[%c0_85, %c1_86, %c0_87, %c0_88] : memref<4x7x8x28xf32, #tpu.memory_space<vmem>>, vector<1x6x8x28xf32>
    %69 = vector.shape_cast %68 : vector<1x6x8x28xf32> to vector<6x8x28xf32>
    %70 = vector.shape_cast %69 : vector<6x8x28xf32> to vector<48x28xf32>
    %c2_89 = arith.constant 2 : index
    %c0_90 = arith.constant 0 : index
    %c0_91 = arith.constant 0 : index
    %71 = vector.load %arg2[%c2_89, %c0_90, %c0_91] : memref<6x28x120xf32, #tpu.memory_space<vmem>>, vector<1x28x120xf32>
    %72 = vector.shape_cast %71 : vector<1x28x120xf32> to vector<28x120xf32>
    %cst_92 = arith.constant dense<0.000000e+00> : vector<48x120xf32>
    %73 = tpu.matmul %70, %72, %cst_92 {dimension_numbers = #tpu.dot_dimension_numbers<[1], [0], [0], [1], [0, 0, 1, 1], [], []>} : vector<48x28xf32>, vector<28x120xf32>, vector<48x120xf32> -> vector<48x120xf32>
    %c0_93 = arith.constant 0 : index
    %c0_94 = arith.constant 0 : index
    %74 = vector.load %arg12[%c0_93, %c0_94] : memref<48x120xf32, #tpu.memory_space<vmem>>, vector<48x120xf32>
    %75 = arith.addf %74, %73 : vector<48x120xf32>
    %c0_95 = arith.constant 0 : index
    %c0_96 = arith.constant 0 : index
    %76 = vector.load %arg12[%c0_95, %c0_96] : memref<48x120xf32, #tpu.memory_space<vmem>>, vector<48x120xf32>
    tpu.vector_store %arg12[%c0_95, %c0_96], %75 {strides = array<i32>} : memref<48x120xf32, #tpu.memory_space<vmem>>, vector<48x120xf32>,
    %c1_97 = arith.constant 1 : index
    %c1_98 = arith.constant 1 : index
    %c0_99 = arith.constant 0 : index
    %c0_100 = arith.constant 0 : index
    %77 = vector.load %arg1[%c1_97, %c1_98, %c0_99, %c0_100] : memref<4x7x8x28xf32, #tpu.memory_space<vmem>>, vector<1x6x8x28xf32>
    %78 = vector.shape_cast %77 : vector<1x6x8x28xf32> to vector<6x8x28xf32>
    %79 = vector.shape_cast %78 : vector<6x8x28xf32> to vector<48x28xf32>
    %c3_101 = arith.constant 3 : index
    %c0_102 = arith.constant 0 : index
    %c0_103 = arith.constant 0 : index
    %80 = vector.load %arg2[%c3_101, %c0_102, %c0_103] : memref<6x28x120xf32, #tpu.memory_space<vmem>>, vector<1x28x120xf32>
    %81 = vector.shape_cast %80 : vector<1x28x120xf32> to vector<28x120xf32>
    %cst_104 = arith.constant dense<0.000000e+00> : vector<48x120xf32>
    %82 = tpu.matmul %79, %81, %cst_104 {dimension_numbers = #tpu.dot_dimension_numbers<[1], [0], [0], [1], [0, 0, 1, 1], [], []>} : vector<48x28xf32>, vector<28x120xf32>, vector<48x120xf32> -> vector<48x120xf32>
    %c0_105 = arith.constant 0 : index
    %c0_106 = arith.constant 0 : index
    %83 = vector.load %arg12[%c0_105, %c0_106] : memref<48x120xf32, #tpu.memory_space<vmem>>, vector<48x120xf32>
    %84 = arith.addf %83, %82 : vector<48x120xf32>
    %c0_107 = arith.constant 0 : index
    %c0_108 = arith.constant 0 : index
    %85 = vector.load %arg12[%c0_107, %c0_108] : memref<48x120xf32, #tpu.memory_space<vmem>>, vector<48x120xf32>
    tpu.vector_store %arg12[%c0_107, %c0_108], %84 {strides = array<i32>} : memref<48x120xf32, #tpu.memory_space<vmem>>, vector<48x120xf32>,
    %c2_109 = arith.constant 2 : index
    %c1_110 = arith.constant 1 : index
    %c0_111 = arith.constant 0 : index
    %c0_112 = arith.constant 0 : index
    %86 = vector.load %arg1[%c2_109, %c1_110, %c0_111, %c0_112] : memref<4x7x8x28xf32, #tpu.memory_space<vmem>>, vector<1x6x8x28xf32>
    %87 = vector.shape_cast %86 : vector<1x6x8x28xf32> to vector<6x8x28xf32>
    %88 = vector.shape_cast %87 : vector<6x8x28xf32> to vector<48x28xf32>
    %c4_113 = arith.constant 4 : index
    %c0_114 = arith.constant 0 : index
    %c0_115 = arith.constant 0 : index
    %89 = vector.load %arg2[%c4_113, %c0_114, %c0_115] : memref<6x28x120xf32, #tpu.memory_space<vmem>>, vector<1x28x120xf32>
    %90 = vector.shape_cast %89 : vector<1x28x120xf32> to vector<28x120xf32>
    %cst_116 = arith.constant dense<0.000000e+00> : vector<48x120xf32>
    %91 = tpu.matmul %88, %90, %cst_116 {dimension_numbers = #tpu.dot_dimension_numbers<[1], [0], [0], [1], [0, 0, 1, 1], [], []>} : vector<48x28xf32>, vector<28x120xf32>, vector<48x120xf32> -> vector<48x120xf32>
    %c0_117 = arith.constant 0 : index
    %c0_118 = arith.constant 0 : index
    %92 = vector.load %arg12[%c0_117, %c0_118] : memref<48x120xf32, #tpu.memory_space<vmem>>, vector<48x120xf32>
    %93 = arith.addf %92, %91 : vector<48x120xf32>
    %c0_119 = arith.constant 0 : index
    %c0_120 = arith.constant 0 : index
    %94 = vector.load %arg12[%c0_119, %c0_120] : memref<48x120xf32, #tpu.memory_space<vmem>>, vector<48x120xf32>
    tpu.vector_store %arg12[%c0_119, %c0_120], %93 {strides = array<i32>} : memref<48x120xf32, #tpu.memory_space<vmem>>, vector<48x120xf32>,
    %c3_121 = arith.constant 3 : index
    %c1_122 = arith.constant 1 : index
    %c0_123 = arith.constant 0 : index
    %c0_124 = arith.constant 0 : index
    %95 = vector.load %arg1[%c3_121, %c1_122, %c0_123, %c0_124] : memref<4x7x8x28xf32, #tpu.memory_space<vmem>>, vector<1x6x8x28xf32>
    %96 = vector.shape_cast %95 : vector<1x6x8x28xf32> to vector<6x8x28xf32>
    %97 = vector.shape_cast %96 : vector<6x8x28xf32> to vector<48x28xf32>
    %c5_125 = arith.constant 5 : index
    %c0_126 = arith.constant 0 : index
    %c0_127 = arith.constant 0 : index
    %98 = vector.load %arg2[%c5_125, %c0_126, %c0_127] : memref<6x28x120xf32, #tpu.memory_space<vmem>>, vector<1x28x120xf32>
    %99 = vector.shape_cast %98 : vector<1x28x120xf32> to vector<28x120xf32>
    %cst_128 = arith.constant dense<0.000000e+00> : vector<48x120xf32>
    %100 = tpu.matmul %97, %99, %cst_128 {dimension_numbers = #tpu.dot_dimension_numbers<[1], [0], [0], [1], [0, 0, 1, 1], [], []>} : vector<48x28xf32>, vector<28x120xf32>, vector<48x120xf32> -> vector<48x120xf32>
    %c0_129 = arith.constant 0 : index
    %c0_130 = arith.constant 0 : index
    %101 = vector.load %arg12[%c0_129, %c0_130] : memref<48x120xf32, #tpu.memory_space<vmem>>, vector<48x120xf32>
    %102 = arith.addf %101, %100 : vector<48x120xf32>
    %c0_131 = arith.constant 0 : index
    %c0_132 = arith.constant 0 : index
    %103 = vector.load %arg12[%c0_131, %c0_132] : memref<48x120xf32, #tpu.memory_space<vmem>>, vector<48x120xf32>
    tpu.vector_store %arg12[%c0_131, %c0_132], %102 {strides = array<i32>} : memref<48x120xf32, #tpu.memory_space<vmem>>, vector<48x120xf32>,
    %c0_133 = arith.constant 0 : index
    %c0_134 = arith.constant 0 : index
    %104 = vector.load %arg11[%c0_133, %c0_134] : memref<48x120xf32, #tpu.memory_space<vmem>>, vector<48x120xf32>
    %c0_135 = arith.constant 0 : index
    %c0_136 = arith.constant 0 : index
    %105 = vector.load %arg6[%c0_135, %c0_136] : memref<1x120xf32, #tpu.memory_space<vmem>>, vector<1x120xf32>
    %106 = vector.broadcast %105 : vector<1x120xf32> to vector<48x120xf32>
    %107 = arith.addf %104, %106 : vector<48x120xf32>
    %108 = math.tanh %107 : vector<48x120xf32>
    %c0_137 = arith.constant 0 : index
    %c0_138 = arith.constant 0 : index
    %109 = vector.load %arg11[%c0_137, %c0_138] : memref<48x120xf32, #tpu.memory_space<vmem>>, vector<48x120xf32>
    tpu.vector_store %arg11[%c0_137, %c0_138], %108 {strides = array<i32>} : memref<48x120xf32, #tpu.memory_space<vmem>>, vector<48x120xf32>,
    %c0_139 = arith.constant 0 : index
    %c0_140 = arith.constant 0 : index
    %110 = vector.load %arg12[%c0_139, %c0_140] : memref<48x120xf32, #tpu.memory_space<vmem>>, vector<48x120xf32>
    %c0_141 = arith.constant 0 : index
    %c0_142 = arith.constant 0 : index
    %111 = vector.load %arg6[%c0_141, %c0_142] : memref<1x120xf32, #tpu.memory_space<vmem>>, vector<1x120xf32>
    %112 = vector.broadcast %111 : vector<1x120xf32> to vector<48x120xf32>
    %113 = arith.addf %110, %112 : vector<48x120xf32>
    %114 = math.tanh %113 : vector<48x120xf32>
    %c0_143 = arith.constant 0 : index
    %c0_144 = arith.constant 0 : index
    %115 = vector.load %arg12[%c0_143, %c0_144] : memref<48x120xf32, #tpu.memory_space<vmem>>, vector<48x120xf32>
    tpu.vector_store %arg12[%c0_143, %c0_144], %114 {strides = array<i32>} : memref<48x120xf32, #tpu.memory_space<vmem>>, vector<48x120xf32>,
    %c0_145 = arith.constant 0 : index
    %c0_146 = arith.constant 0 : index
    %116 = vector.load %arg11[%c0_145, %c0_146] : memref<48x120xf32, #tpu.memory_space<vmem>>, vector<32x120xf32>
    %c0_147 = arith.constant 0 : index
    %c0_148 = arith.constant 0 : index
    %c0_149 = arith.constant 0 : index
    %117 = vector.load %arg3[%c0_147, %c0_148, %c0_149] : memref<6x120x80xf32, #tpu.memory_space<vmem>>, vector<1x120x80xf32>
    %118 = vector.shape_cast %117 : vector<1x120x80xf32> to vector<120x80xf32>
    %cst_150 = arith.constant dense<0.000000e+00> : vector<32x80xf32>
    %119 = tpu.matmul %116, %118, %cst_150 {dimension_numbers = #tpu.dot_dimension_numbers<[1], [0], [0], [1], [0, 0, 1, 1], [], []>} : vector<32x120xf32>, vector<120x80xf32>, vector<32x80xf32> -> vector<32x80xf32>
    %c0_151 = arith.constant 0 : index
    %c0_152 = arith.constant 0 : index
    %120 = vector.load %arg13[%c0_151, %c0_152] : memref<32x80xf32, #tpu.memory_space<vmem>>, vector<32x80xf32>
    tpu.vector_store %arg13[%c0_151, %c0_152], %119 {strides = array<i32>} : memref<32x80xf32, #tpu.memory_space<vmem>>, vector<32x80xf32>,
    %c0_153 = arith.constant 0 : index
    %c0_154 = arith.constant 0 : index
    %121 = vector.load %arg12[%c0_153, %c0_154] : memref<48x120xf32, #tpu.memory_space<vmem>>, vector<32x120xf32>
    %c1_155 = arith.constant 1 : index
    %c0_156 = arith.constant 0 : index
    %c0_157 = arith.constant 0 : index
    %122 = vector.load %arg3[%c1_155, %c0_156, %c0_157] : memref<6x120x80xf32, #tpu.memory_space<vmem>>, vector<1x120x80xf32>
    %123 = vector.shape_cast %122 : vector<1x120x80xf32> to vector<120x80xf32>
    %cst_158 = arith.constant dense<0.000000e+00> : vector<32x80xf32>
    %124 = tpu.matmul %121, %123, %cst_158 {dimension_numbers = #tpu.dot_dimension_numbers<[1], [0], [0], [1], [0, 0, 1, 1], [], []>} : vector<32x120xf32>, vector<120x80xf32>, vector<32x80xf32> -> vector<32x80xf32>
    %c0_159 = arith.constant 0 : index
    %c0_160 = arith.constant 0 : index
    %125 = vector.load %arg13[%c0_159, %c0_160] : memref<32x80xf32, #tpu.memory_space<vmem>>, vector<32x80xf32>
    %126 = arith.addf %125, %124 : vector<32x80xf32>
    %c0_161 = arith.constant 0 : index
    %c0_162 = arith.constant 0 : index
    %127 = vector.load %arg13[%c0_161, %c0_162] : memref<32x80xf32, #tpu.memory_space<vmem>>, vector<32x80xf32>
    tpu.vector_store %arg13[%c0_161, %c0_162], %126 {strides = array<i32>} : memref<32x80xf32, #tpu.memory_space<vmem>>, vector<32x80xf32>,
    %c8 = arith.constant 8 : index
    %c0_163 = arith.constant 0 : index
    %128 = vector.load %arg11[%c8, %c0_163] : memref<48x120xf32, #tpu.memory_space<vmem>>, vector<32x120xf32>
    %c2_164 = arith.constant 2 : index
    %c0_165 = arith.constant 0 : index
    %c0_166 = arith.constant 0 : index
    %129 = vector.load %arg3[%c2_164, %c0_165, %c0_166] : memref<6x120x80xf32, #tpu.memory_space<vmem>>, vector<1x120x80xf32>
    %130 = vector.shape_cast %129 : vector<1x120x80xf32> to vector<120x80xf32>
    %cst_167 = arith.constant dense<0.000000e+00> : vector<32x80xf32>
    %131 = tpu.matmul %128, %130, %cst_167 {dimension_numbers = #tpu.dot_dimension_numbers<[1], [0], [0], [1], [0, 0, 1, 1], [], []>} : vector<32x120xf32>, vector<120x80xf32>, vector<32x80xf32> -> vector<32x80xf32>
    %c0_168 = arith.constant 0 : index
    %c0_169 = arith.constant 0 : index
    %132 = vector.load %arg13[%c0_168, %c0_169] : memref<32x80xf32, #tpu.memory_space<vmem>>, vector<32x80xf32>
    %133 = arith.addf %132, %131 : vector<32x80xf32>
    %c0_170 = arith.constant 0 : index
    %c0_171 = arith.constant 0 : index
    %134 = vector.load %arg13[%c0_170, %c0_171] : memref<32x80xf32, #tpu.memory_space<vmem>>, vector<32x80xf32>
    tpu.vector_store %arg13[%c0_170, %c0_171], %133 {strides = array<i32>} : memref<32x80xf32, #tpu.memory_space<vmem>>, vector<32x80xf32>,
    %c8_172 = arith.constant 8 : index
    %c0_173 = arith.constant 0 : index
    %135 = vector.load %arg12[%c8_172, %c0_173] : memref<48x120xf32, #tpu.memory_space<vmem>>, vector<32x120xf32>
    %c3_174 = arith.constant 3 : index
    %c0_175 = arith.constant 0 : index
    %c0_176 = arith.constant 0 : index
    %136 = vector.load %arg3[%c3_174, %c0_175, %c0_176] : memref<6x120x80xf32, #tpu.memory_space<vmem>>, vector<1x120x80xf32>
    %137 = vector.shape_cast %136 : vector<1x120x80xf32> to vector<120x80xf32>
    %cst_177 = arith.constant dense<0.000000e+00> : vector<32x80xf32>
    %138 = tpu.matmul %135, %137, %cst_177 {dimension_numbers = #tpu.dot_dimension_numbers<[1], [0], [0], [1], [0, 0, 1, 1], [], []>} : vector<32x120xf32>, vector<120x80xf32>, vector<32x80xf32> -> vector<32x80xf32>
    %c0_178 = arith.constant 0 : index
    %c0_179 = arith.constant 0 : index
    %139 = vector.load %arg13[%c0_178, %c0_179] : memref<32x80xf32, #tpu.memory_space<vmem>>, vector<32x80xf32>
    %140 = arith.addf %139, %138 : vector<32x80xf32>
    %c0_180 = arith.constant 0 : index
    %c0_181 = arith.constant 0 : index
    %141 = vector.load %arg13[%c0_180, %c0_181] : memref<32x80xf32, #tpu.memory_space<vmem>>, vector<32x80xf32>
    tpu.vector_store %arg13[%c0_180, %c0_181], %140 {strides = array<i32>} : memref<32x80xf32, #tpu.memory_space<vmem>>, vector<32x80xf32>,
    %c16 = arith.constant 16 : index
    %c0_182 = arith.constant 0 : index
    %142 = vector.load %arg11[%c16, %c0_182] : memref<48x120xf32, #tpu.memory_space<vmem>>, vector<32x120xf32>
    %c4_183 = arith.constant 4 : index
    %c0_184 = arith.constant 0 : index
    %c0_185 = arith.constant 0 : index
    %143 = vector.load %arg3[%c4_183, %c0_184, %c0_185] : memref<6x120x80xf32, #tpu.memory_space<vmem>>, vector<1x120x80xf32>
    %144 = vector.shape_cast %143 : vector<1x120x80xf32> to vector<120x80xf32>
    %cst_186 = arith.constant dense<0.000000e+00> : vector<32x80xf32>
    %145 = tpu.matmul %142, %144, %cst_186 {dimension_numbers = #tpu.dot_dimension_numbers<[1], [0], [0], [1], [0, 0, 1, 1], [], []>} : vector<32x120xf32>, vector<120x80xf32>, vector<32x80xf32> -> vector<32x80xf32>
    %c0_187 = arith.constant 0 : index
    %c0_188 = arith.constant 0 : index
    %146 = vector.load %arg13[%c0_187, %c0_188] : memref<32x80xf32, #tpu.memory_space<vmem>>, vector<32x80xf32>
    %147 = arith.addf %146, %145 : vector<32x80xf32>
    %c0_189 = arith.constant 0 : index
    %c0_190 = arith.constant 0 : index
    %148 = vector.load %arg13[%c0_189, %c0_190] : memref<32x80xf32, #tpu.memory_space<vmem>>, vector<32x80xf32>
    tpu.vector_store %arg13[%c0_189, %c0_190], %147 {strides = array<i32>} : memref<32x80xf32, #tpu.memory_space<vmem>>, vector<32x80xf32>,
    %c16_191 = arith.constant 16 : index
    %c0_192 = arith.constant 0 : index
    %149 = vector.load %arg12[%c16_191, %c0_192] : memref<48x120xf32, #tpu.memory_space<vmem>>, vector<32x120xf32>
    %c5_193 = arith.constant 5 : index
    %c0_194 = arith.constant 0 : index
    %c0_195 = arith.constant 0 : index
    %150 = vector.load %arg3[%c5_193, %c0_194, %c0_195] : memref<6x120x80xf32, #tpu.memory_space<vmem>>, vector<1x120x80xf32>
    %151 = vector.shape_cast %150 : vector<1x120x80xf32> to vector<120x80xf32>
    %cst_196 = arith.constant dense<0.000000e+00> : vector<32x80xf32>
    %152 = tpu.matmul %149, %151, %cst_196 {dimension_numbers = #tpu.dot_dimension_numbers<[1], [0], [0], [1], [0, 0, 1, 1], [], []>} : vector<32x120xf32>, vector<120x80xf32>, vector<32x80xf32> -> vector<32x80xf32>
    %c0_197 = arith.constant 0 : index
    %c0_198 = arith.constant 0 : index
    %153 = vector.load %arg13[%c0_197, %c0_198] : memref<32x80xf32, #tpu.memory_space<vmem>>, vector<32x80xf32>
    %154 = arith.addf %153, %152 : vector<32x80xf32>
    %c0_199 = arith.constant 0 : index
    %c0_200 = arith.constant 0 : index
    %155 = vector.load %arg13[%c0_199, %c0_200] : memref<32x80xf32, #tpu.memory_space<vmem>>, vector<32x80xf32>
    tpu.vector_store %arg13[%c0_199, %c0_200], %154 {strides = array<i32>} : memref<32x80xf32, #tpu.memory_space<vmem>>, vector<32x80xf32>,
    %c0_201 = arith.constant 0 : index
    %c0_202 = arith.constant 0 : index
    %156 = vector.load %arg13[%c0_201, %c0_202] : memref<32x80xf32, #tpu.memory_space<vmem>>, vector<32x80xf32>
    %c0_203 = arith.constant 0 : index
    %c0_204 = arith.constant 0 : index
    %157 = vector.load %arg7[%c0_203, %c0_204] : memref<1x80xf32, #tpu.memory_space<vmem>>, vector<1x80xf32>
    %158 = vector.broadcast %157 : vector<1x80xf32> to vector<32x80xf32>
    %159 = arith.addf %156, %158 : vector<32x80xf32>
    %160 = math.tanh %159 : vector<32x80xf32>
    %161 = vector.extract_strided_slice %160 {offsets = [0, 0], sizes = [8, 80], strides = [1, 1]} : vector<32x80xf32> to vector<8x80xf32>
    %c0_205 = arith.constant 0 : index
    %c0_206 = arith.constant 0 : index
    %c0_207 = arith.constant 0 : index
    %162 = vector.load %arg4[%c0_205, %c0_206, %c0_207] : memref<4x80x50xf32, #tpu.memory_space<vmem>>, vector<1x80x50xf32>
    %163 = vector.shape_cast %162 : vector<1x80x50xf32> to vector<80x50xf32>
    %cst_208 = arith.constant dense<0.000000e+00> : vector<8x50xf32>
    %164 = tpu.matmul %161, %163, %cst_208 {dimension_numbers = #tpu.dot_dimension_numbers<[1], [0], [0], [1], [0, 0, 1, 1], [], []>} : vector<8x80xf32>, vector<80x50xf32>, vector<8x50xf32> -> vector<8x50xf32>
    %165 = vector.extract_strided_slice %160 {offsets = [8, 0], sizes = [8, 80], strides = [1, 1]} : vector<32x80xf32> to vector<8x80xf32>
    %c1_209 = arith.constant 1 : index
    %c0_210 = arith.constant 0 : index
    %c0_211 = arith.constant 0 : index
    %166 = vector.load %arg4[%c1_209, %c0_210, %c0_211] : memref<4x80x50xf32, #tpu.memory_space<vmem>>, vector<1x80x50xf32>
    %167 = vector.shape_cast %166 : vector<1x80x50xf32> to vector<80x50xf32>
    %cst_212 = arith.constant dense<0.000000e+00> : vector<8x50xf32>
    %168 = tpu.matmul %165, %167, %cst_212 {dimension_numbers = #tpu.dot_dimension_numbers<[1], [0], [0], [1], [0, 0, 1, 1], [], []>} : vector<8x80xf32>, vector<80x50xf32>, vector<8x50xf32> -> vector<8x50xf32>
    %169 = arith.addf %164, %168 : vector<8x50xf32>
    %170 = vector.extract_strided_slice %160 {offsets = [16, 0], sizes = [8, 80], strides = [1, 1]} : vector<32x80xf32> to vector<8x80xf32>
    %c2_213 = arith.constant 2 : index
    %c0_214 = arith.constant 0 : index
    %c0_215 = arith.constant 0 : index
    %171 = vector.load %arg4[%c2_213, %c0_214, %c0_215] : memref<4x80x50xf32, #tpu.memory_space<vmem>>, vector<1x80x50xf32>
    %172 = vector.shape_cast %171 : vector<1x80x50xf32> to vector<80x50xf32>
    %cst_216 = arith.constant dense<0.000000e+00> : vector<8x50xf32>
    %173 = tpu.matmul %170, %172, %cst_216 {dimension_numbers = #tpu.dot_dimension_numbers<[1], [0], [0], [1], [0, 0, 1, 1], [], []>} : vector<8x80xf32>, vector<80x50xf32>, vector<8x50xf32> -> vector<8x50xf32>
    %174 = arith.addf %169, %173 : vector<8x50xf32>
    %175 = vector.extract_strided_slice %160 {offsets = [24, 0], sizes = [8, 80], strides = [1, 1]} : vector<32x80xf32> to vector<8x80xf32>
    %c3_217 = arith.constant 3 : index
    %c0_218 = arith.constant 0 : index
    %c0_219 = arith.constant 0 : index
    %176 = vector.load %arg4[%c3_217, %c0_218, %c0_219] : memref<4x80x50xf32, #tpu.memory_space<vmem>>, vector<1x80x50xf32>
    %177 = vector.shape_cast %176 : vector<1x80x50xf32> to vector<80x50xf32>
    %cst_220 = arith.constant dense<0.000000e+00> : vector<8x50xf32>
    %178 = tpu.matmul %175, %177, %cst_220 {dimension_numbers = #tpu.dot_dimension_numbers<[1], [0], [0], [1], [0, 0, 1, 1], [], []>} : vector<8x80xf32>, vector<80x50xf32>, vector<8x50xf32> -> vector<8x50xf32>
    %179 = arith.addf %174, %178 : vector<8x50xf32>
    %c0_221 = arith.constant 0 : index
    %c0_222 = arith.constant 0 : index
    %180 = vector.load %arg8[%c0_221, %c0_222] : memref<1x50xf32, #tpu.memory_space<vmem>>, vector<1x50xf32>
    %181 = vector.broadcast %180 : vector<1x50xf32> to vector<8x50xf32>
    %182 = arith.addf %179, %181 : vector<8x50xf32>
    %183 = math.tanh %182 : vector<8x50xf32>
    %c0_223 = arith.constant 0 : index
    %c0_224 = arith.constant 0 : index
    %184 = vector.load %arg5[%c0_223, %c0_224] : memref<50x10xf32, #tpu.memory_space<vmem>>, vector<50x10xf32>
    %cst_225 = arith.constant dense<0.000000e+00> : vector<8x10xf32>
    %185 = tpu.matmul %183, %184, %cst_225 {dimension_numbers = #tpu.dot_dimension_numbers<[1], [0], [0], [1], [0, 0, 1, 1], [], []>} : vector<8x50xf32>, vector<50x10xf32>, vector<8x10xf32> -> vector<8x10xf32>
    %c0_226 = arith.constant 0 : index
    %c0_227 = arith.constant 0 : index
    %186 = vector.load %arg9[%c0_226, %c0_227] : memref<1x10xf32, #tpu.memory_space<vmem>>, vector<1x10xf32>
    %187 = vector.broadcast %186 : vector<1x10xf32> to vector<8x10xf32>
    %188 = arith.addf %185, %187 : vector<8x10xf32>
    %cst_228 = arith.constant dense<0xFF800000> : vector<8xf32>
    %189 = vector.multi_reduction <maximumf>, %188, %cst_228 [1] : vector<8x10xf32> to vector<8xf32>
    %190 = vector.shape_cast %189 : vector<8xf32> to vector<8x1xf32>
    %191 = vector.broadcast %190 : vector<8x1xf32> to vector<8x10xf32>
    %192 = arith.subf %188, %191 : vector<8x10xf32>
    %193 = math.exp %192 : vector<8x10xf32>
    %cst_229 = arith.constant dense<0.000000e+00> : vector<8xf32>
    %194 = vector.multi_reduction <add>, %193, %cst_229 [1] : vector<8x10xf32> to vector<8xf32>
    %195 = vector.shape_cast %194 : vector<8xf32> to vector<8x1xf32>
    %196 = math.log %195 : vector<8x1xf32>
    %197 = vector.broadcast %196 : vector<8x1xf32> to vector<8x10xf32>
    %198 = arith.subf %192, %197 : vector<8x10xf32>
    %c0_230 = arith.constant 0 : index
    %c0_231 = arith.constant 0 : index
    %199 = vector.load %arg10[%c0_230, %c0_231] : memref<8x10xf32, #tpu.memory_space<vmem>>, vector<8x10xf32>
    tpu.vector_store %arg10[%c0_230, %c0_231], %198 {strides = array<i32>} : memref<8x10xf32, #tpu.memory_space<vmem>>, vector<8x10xf32>,
    return
  }
  func.func @transform_0(%arg0: i32) -> (i32, i32, i32, i32) {
    %c0_i32 = arith.constant 0 : i32
    %c0_i32_0 = arith.constant 0 : i32
    %c0_i32_1 = arith.constant 0 : i32
    %c0_i32_2 = arith.constant 0 : i32
    return %c0_i32, %c0_i32_0, %arg0, %c0_i32_1 : i32, i32, i32, i32
  }
  func.func @transform_1(%arg0: i32) -> (i32, i32, i32) {
    %c0_i32 = arith.constant 0 : i32
    %c0_i32_0 = arith.constant 0 : i32
    %c0_i32_1 = arith.constant 0 : i32
    %c0_i32_2 = arith.constant 0 : i32
    return %c0_i32, %c0_i32_0, %c0_i32_1 : i32, i32, i32
  }
  func.func @transform_2(%arg0: i32) -> (i32, i32, i32) {
    %c0_i32 = arith.constant 0 : i32
    %c0_i32_0 = arith.constant 0 : i32
    %c0_i32_1 = arith.constant 0 : i32
    %c0_i32_2 = arith.constant 0 : i32
    return %c0_i32, %c0_i32_0, %c0_i32_1 : i32, i32, i32
  }
  func.func @transform_3(%arg0: i32) -> (i32, i32, i32) {
    %c0_i32 = arith.constant 0 : i32
    %c0_i32_0 = arith.constant 0 : i32
    %c0_i32_1 = arith.constant 0 : i32
    %c0_i32_2 = arith.constant 0 : i32
    return %c0_i32, %c0_i32_0, %c0_i32_1 : i32, i32, i32
  }
  func.func @transform_4(%arg0: i32) -> (i32, i32) {
    %c0_i32 = arith.constant 0 : i32
    %c0_i32_0 = arith.constant 0 : i32
    %c0_i32_1 = arith.constant 0 : i32
    return %c0_i32, %c0_i32_0 : i32, i32
  }
  func.func @transform_5(%arg0: i32) -> (i32, i32) {
    %c0_i32 = arith.constant 0 : i32
    %c0_i32_0 = arith.constant 0 : i32
    %c0_i32_1 = arith.constant 0 : i32
    return %c0_i32, %c0_i32_0 : i32, i32
  }
  func.func @transform_6(%arg0: i32) -> (i32, i32) {
    %c0_i32 = arith.constant 0 : i32
    %c0_i32_0 = arith.constant 0 : i32
    %c0_i32_1 = arith.constant 0 : i32
    return %c0_i32, %c0_i32_0 : i32, i32
  }
  func.func @transform_7(%arg0: i32) -> (i32, i32) {
    %c0_i32 = arith.constant 0 : i32
    %c0_i32_0 = arith.constant 0 : i32
    %c0_i32_1 = arith.constant 0 : i32
    return %c0_i32, %c0_i32_0 : i32, i32
  }
  func.func @transform_8(%arg0: i32) -> (i32, i32) {
    %c0_i32 = arith.constant 0 : i32
    %c0_i32_0 = arith.constant 0 : i32
    %c0_i32_1 = arith.constant 0 : i32
    return %c0_i32, %c0_i32_0 : i32, i32
  }
  func.func @transform_9(%arg0: i32) -> (i32, i32) {
    %c0_i32 = arith.constant 0 : i32
    %c0_i32_0 = arith.constant 0 : i32
    return %arg0, %c0_i32 : i32, i32
  }
}

</mosaic_0001>

<bundles_post_ra>
// kernel: mnist_net_forward.1
= control target key start
LH: loop header
LB: loop body
LE: loop exit
PB: predicated region body
PF: predicated region fallthrough
CT: control target
= control target key end

     0   :  { %vm61_vm0 = vcmask 1043456   ;;  %vm42_vm1 = vcmask 228352   ;;  %vm4602_vm2 = vmmov 1   ;;  %vm160_vm4 = vcmask 982016   ;;  %s5809_s1 = inlined_call_operand.vmem [shape: f32[6,28,120], index: 1, kind: input, shape index: {}]   ;;  %s5810_s0 = inlined_call_operand.vmem [shape: f32[4,7,8,28], index: 0, kind: input, shape index: {}]   ;;  %s5811_s2 = inlined_call_operand.vmem [shape: f32[6,120,80], index: 2, kind: input, shape index: {}]   ;;  %s5812_s5 = inlined_call_operand.vmem [shape: f32[1,120], index: 5, kind: input, shape index: {}]   ;;  %s5813_s3 = inlined_call_operand.vmem [shape: f32[4,80,50], index: 3, kind: input, shape index: {}]   ;;  %s5814_s6 = inlined_call_operand.vmem [shape: f32[1,80], index: 6, kind: input, shape index: {}]   ;;  %s5815_s4 = inlined_call_operand.vmem [shape: f32[50,10], index: 4, kind: input, shape index: {}]   ;;  %s5816_s7 = inlined_call_operand.vmem [shape: f32[1,50], index: 7, kind: input, shape index: {}]   ;;  %s5817_s8 = inlined_call_operand.vmem [shape: f32[1,10], index: 8, kind: input, shape index: {}]   ;;  %s5818_s9 = inlined_call_operand.vmem [shape: f32[8,10], index: 9, kind: output, shape index: {}]  }
   0x1   :  { %v38_v0 = vld [vmem:[%s5809_s1] sm:$0xff]  ;;  %v39_v1 = vld [vmem:[%s5809_s1 + $0x8] sm:$0xff]  ;;  %v4665_v2 = vld [vmem:[%s5809_s1 + $0x10] sm:$0xff]  ;;  %vm4604_vm5 = vmmov 0   ;;  %vm1929_vm6 = vcmask 654336   ;;  %vm2962_vm7 = vcmask 1041408  }
   0x2   :  { %v4667_v3 = vpack.c.bf16 %v39_v1, %v38_v0  ;;  %v41_v4 = vld [vmem:[%s5809_s1 + $0x18] sm:$0xf]  ;;  %v32_v5 = vld [vmem:[%s5810_s0] sm:$0xff]  ;;  %vm4676_vm3 = vmpackc.low %vm61_vm0, %vm4602_vm2  ;;  %vm2958_vm8 = vcmask 408576   ;;  %vm3036_vm9 = vcmask 80896  }
   0x3   :  { %v4203_v6 = vpack.c.bf16 %v41_v4, %v4665_v2  ;;  %3678 = vmatprep.mubr.msk.f32.mxu0 %vm42_vm1, %v32_v5  ;;  %v4686_v8 = vld [vmem:[%s5810_s0 + $0x20] sm:$0xff]  ;;  %v3068_v10 = vld [vmem:[%s5809_s1 + $0x28] sm:$0xff]  ;;  %v4713_v14 = vld [vmem:[%s5809_s1 + $0x30] sm:$0xff] }
   0x4   :  { %4200 = vmatprep.subr.bf16.mxu0 %v4667_v3  ;;  %4556 = vmatprep.subr.bf16.mxu1 %v4667_v3  ;;  %v3067_v9 = vld [vmem:[%s5809_s1 + $0x20] sm:$0xff]  ;;  %v3085_v13 = vld [vmem:[%s5809_s1 + $0x48] sm:$0xff]  ;;  %v3070_v15 = vld [vmem:[%s5809_s1 + $0x38] sm:$0xf] }
   0x5   :  { %4202 = vmatpush3.bf16.msra.mxu0 %v4667_v3  ;;  %4558 = vmatpush3.bf16.msra.mxu1 %v4667_v3  ;;  %v4700_v11 = vpack.c.bf16 %v3068_v10, %v3067_v9  ;;  %v3084_v12 = vld [vmem:[%s5809_s1 + $0x40] sm:$0xff]  ;;  %v4723_v17 = vld [vmem:[%s5809_s1 + $0x50] sm:$0xff]  ;;  %v3087_v18 = vld [vmem:[%s5809_s1 + $0x58] sm:$0xf]  ;;  %v4213_v22 = vpack.c.bf16 %v3070_v15, %v4713_v14 }
   0x6   :  { %4205 = vmatprep.subr.msk.bf16.mxu0 %vm4676_vm3, %v4203_v6  ;;  %4557 = vmatprep.subr.msk.bf16.mxu1 %vm4676_vm3, %v4203_v6  ;;  %v4718_v16 = vpack.c.bf16 %v3085_v13, %v3084_v12  ;;  %v4735_v19 = vld [vmem:[%s5810_s0 + $0x8] sm:$0xff]  ;;  %v4746_v21 = vld [vmem:[%s5810_s0 + $0x10] sm:$0xff]  ;;  %v4223_v23 = vpack.c.bf16 %v3087_v18, %v4723_v17  ;;  %v3101_v24 = vld [vmem:[%s5809_s1 + $0x60] sm:$0xff] }
   0x7   :  { %3684 = vmatprep.mubr.msk.f32.mxu1 %vm42_vm1, %v4686_v8  ;;  %v4740_v20 = vld [vmem:[%s5810_s0 + $0x28] sm:$0xff]  ;;  %v3061_v26 = vld [vmem:[%s5810_s0 + $0x38] sm:$0xff]  ;;  %v3118_v27 = vld [vmem:[%s5809_s1 + $0x80] sm:$0xff] }
   0x8   :  { %v3102_v25 = vld [vmem:[%s5809_s1 + $0x68] sm:$0xff]  ;;  %v4776_v29 = vld [vmem:[%s5810_s0 + $0x18] sm:$0xff]  ;;  %v4786_v31 = vld [vmem:[%s5810_s0 + $0x70] sm:$0xff] }
   0x9   :  { %4208 = vmatpush3.bf16.msk.msra.mxu0 %vm4676_vm3, %v4203_v6  ;;  %4559 = vmatpush3.bf16.msk.msra.mxu1 %vm4676_vm3, %v4203_v6  ;;  %v3119_v28 = vld [vmem:[%s5809_s1 + $0x88] sm:$0xff]  ;;  %v4781_v30 = vpack.c.bf16 %v3102_v25, %v3101_v24  ;;  %v4796_v33 = vld [vmem:[%s5809_s1 + $0x70] sm:$0xff]  ;;  %v3104_v34 = vld [vmem:[%s5809_s1 + $0x78] sm:$0xf] }
   0xa   :  { %4210 = vmatprep.subr.bf16.mxu1 %v4700_v11  ;;  %4220 = vmatprep.subr.bf16.mxu0 %v4718_v16  ;;  %v4791_v32 = vpack.c.bf16 %v3119_v28, %v3118_v27  ;;  %v4808_v35 = vld [vmem:[%s5810_s0 + $0x40] sm:$0xff]  ;;  %v4815_v36 = vld [vmem:[%s5809_s1 + $0x90] sm:$0xff]  ;;  %v3121_v37 = vld [vmem:[%s5809_s1 + $0x98] sm:$0xf]  ;;  %v4233_v39 = vpack.c.bf16 %v3104_v34, %v4796_v33 }
   0xb   :  { %v4826_v38 = vld [vmem:[%s5810_s0 + $0x48] sm:$0xff]  ;;  %v4832_v40 = vld [vmem:[%s5810_s0 + $0x78] sm:$0xff]  ;;  %v3135_v41 = vld [vmem:[%s5809_s1 + $0xa0] sm:$0xff]  ;;  %v4243_v44 = vpack.c.bf16 %v3121_v37, %v4815_v36 }
   0xc   :  { %3679 = vmatmul.mubr.msk.f32.vlgmr.msra.gmra.mrb[0].mxu0 %vm42_vm1, %v4735_v19  ;;  %3685 = vmatmul.mubr.msk.f32.vlgmr.msra.gmra.mrb[0].mxu1 %vm42_vm1, %v4740_v20  ;;  %v3136_v42 = vld [vmem:[%s5809_s1 + $0xa8] sm:$0xff]  ;;  %v4846_v43 = vld [vmem:[%s5810_s0 + $0x80] sm:$0xff]  ;;  %v4855_v45 = vld [vmem:[%s5810_s0 + $0x50] sm:$0xff] }
   0xd   :  { %4212 = vmatpush3.bf16.msra.mxu1 %v4700_v11  ;;  %3681 = vmatprep.mubr.msk.f32.mxu0 %vm42_vm1, %v4746_v21  ;;  %v4864_v46 = vld [vmem:[%s5810_s0 + $0x58] sm:$0xff]  ;;  %v4866_v47 = vpack.c.bf16 %v3136_v42, %v3135_v41  ;;  %v4874_v48 = vld [vmem:[%s5810_s0 + $0x88] sm:$0xff]  ;;  %v4883_v49 = vld [vmem:[%s5810_s0 + $0x90] sm:$0xff] }
   0xe   :  { %4215 = vmatprep.subr.msk.bf16.mxu1 %vm4676_vm3, %v4213_v22  ;;  %4222 = vmatpush3.bf16.msra.mxu0 %v4718_v16  ;;  %v4892_v50 = vld [vmem:[%s5810_s0 + $0x60] sm:$0xff]  ;;  %v4899_v51 = vld [vmem:[%s5810_s0 + $0xa8] sm:$0xff]  ;;  %v4909_v52 = vld [vmem:[%s5810_s0 + $0x98] sm:$0xff] }
   0xf   :  { %3695 = vmatprep.mubr.msk.f32.mxu1 %vm42_vm1, %v3061_v26  ;;  %4225 = vmatprep.subr.msk.bf16.mxu0 %vm4676_vm3, %v4223_v23  ;;  %v4914_v53 = vld [vmem:[%s5809_s1 + $0xb0] sm:$0xff]  ;;  %v3138_v54 = vld [vmem:[%s5809_s1 + $0xb8] sm:$0xf]  ;;  %v4951_v60 = vld [vmem:[%s5810_s0 + $0xc0] sm:$0xff] }
  0x10   :  { %3682 = vmatmul.mubr.msk.f32.gmra.mrb[2].mxu0 %vm42_vm1, %v4776_v29  ;;  %v4927_v55 = vld [vmem:[%s5810_s0 + $0xb0] sm:$0xff]  ;;  %v906_v56 = vld [vmem:[%s5809_s1 + $0x18] sm:$0xf]  ;;  %v4253_v58 = vpack.c.bf16 %v3138_v54, %v4914_v53  ;;  %v4960_v61 = vld [vmem:[%s5810_s0 + $0xc8] sm:$0xff] }
  0x11   :  { %4218 = vmatpush3.bf16.msk.msra.mxu1 %vm4676_vm3, %v4213_v22  ;;  %3712 = vmatprep.mubr.msk.f32.mxu0 %vm42_vm1, %v4786_v31  ;;  %v4937_v57 = vld [vmem:[%s5810_s0 + $0xb8] sm:$0xff]  ;;  %v4263_v59 = vpack.c.bf16 %v906_v56, %v4665_v2  ;;  %v4976_v62 = vld [vmem:[%s5810_s0 + $0xd0] sm:$0xff]  ;;  %v3134_v4 = vld [vmem:[%s5810_s0 + $0x68] sm:$0xff] }
  0x12   :  { %4230 = vmatprep.subr.bf16.mxu1 %v4781_v30  ;;  %4228 = vmatpush3.bf16.msk.msra.mxu0 %vm4676_vm3, %v4223_v23  ;;  %v3117_v63 = vld [vmem:[%s5810_s0 + $0x30] sm:$0xff]  ;;  %v3168_v0 = vld [vmem:[%s5809_s1 + $0x38] sm:$0xf]  ;;  %v3215_v12 = vld [vmem:[%s5810_s0 + $0xa0] sm:$0xff] }
  0x13   :  { %4240 = vmatprep.subr.bf16.mxu0 %v4791_v32  ;;  %v3185_v1 = vld [vmem:[%s5809_s1 + $0x58] sm:$0xf]  ;;  %v4273_v2 = vpack.c.bf16 %v3168_v0, %v4713_v14  ;;  %v1817_v13 = vld [vmem:[%s5811_s2] sm:$0xff]  ;;  %v1818_v14 = vld [vmem:[%s5811_s2 + $0x8] sm:$0xff] }
  0x14   :  { %3696 = vmatmul.mubr.msk.f32.vlgmr.msra.gmra.mrb[2].mxu1 %vm42_vm1, %v4808_v35  ;;  %v3202_v5 = vld [vmem:[%s5809_s1 + $0x78] sm:$0xf]  ;;  %v4319_v15 = vpack.c.bf16 %v1818_v14, %v1817_v13  ;;  %v1823_v22 = vld [vmem:[%s5811_s2 + $0x30] sm:$0xff]  ;;  %v1825_v25 = vld [vmem:[%s5811_s2 + $0x40] sm:$0xff] }
  0x15   :  { %4232 = vmatpush3.bf16.msra.mxu1 %v4781_v30  ;;  %3698 = vmatprep.mubr.msk.f32.mxu1 %vm42_vm1, %v4826_v38  ;;  %v3219_v6 = vld [vmem:[%s5809_s1 + $0x98] sm:$0xf]  ;;  %v4293_v9 = vpack.c.bf16 %v3202_v5, %v4796_v33  ;;  %v1826_v26 = vld [vmem:[%s5811_s2 + $0x48] sm:$0xff]  ;;  %v1827_v28 = vld [vmem:[%s5811_s2 + $0x50] sm:$0xff] }
  0x16   :  { %3713 = vmatmul.mubr.msk.f32.vlgmr.msra.gmra.mrb[4].mxu0 %vm42_vm1, %v4832_v40  ;;  %4235 = vmatprep.subr.msk.bf16.mxu1 %vm4676_vm3, %v4233_v39  ;;  %v4303_v10 = vpack.c.bf16 %v3219_v6, %v4815_v36  ;;  %v3232_v7 = vld [vmem:[%s5810_s0 + $0xd8] sm:$0xff]  ;;  %v4335_v27 = vpack.c.bf16 %v1826_v26, %v1825_v25  ;;  %v1831_v34 = vld [vmem:[%s5811_s2 + $0x70] sm:$0xff]  ;;  %v3252_v41 = vld [vmem:[%s5811_s2 + $0x88] sm:$0xff] }
  0x17   :  { %4242 = vmatpush3.bf16.msra.mxu0 %v4791_v32  ;;  %3715 = vmatprep.mubr.msk.f32.mxu0 %vm42_vm1, %v4846_v43  ;;  %v1824_v23 = vld [vmem:[%s5811_s2 + $0x38] sm:$0xff]  ;;  %v3253_v42 = vld [vmem:[%s5811_s2 + $0x90] sm:$0xff] }
  0x18   :  { %3699 = vmatmul.mubr.msk.f32.gmra.mrb[4].mxu1 %vm42_vm1, %v4855_v45  ;;  %4245 = vmatprep.subr.msk.bf16.mxu0 %vm4676_vm3, %v4243_v44  ;;  %v4331_v24 = vpack.c.bf16 %v1824_v23, %v1823_v22  ;;  %v3270_v36 = vld [vmem:[%s5811_s2 + $0xf8] sm:$0xff]  ;;  %v3261_v54 = vld [vmem:[%s5811_s2 + $0xd0] sm:$0xff] }
  0x19   :  { %3701 = vmatprep.mubr.msk.f32.mxu1 %vm42_vm1, %v4864_v46  ;;  %4238 = vmatpush3.bf16.msk.msra.mxu1 %vm4676_vm3, %v4233_v39  ;;  %v3251_v39 = vld [vmem:[%s5811_s2 + $0x80] sm:$0xff]  ;;  %v3262_v56 = vld [vmem:[%s5811_s2 + $0xd8] sm:$0xff] }
  0x1a   :  { %3716 = vmatmul.mubr.msk.f32.gmra.mrb[6].mxu0 %vm42_vm1, %v4874_v48  ;;  %4250 = vmatprep.subr.bf16.mxu1 %v4866_v47 }
  0x1b   :  { %3718 = vmatprep.mubr.msk.f32.mxu0 %vm42_vm1, %v4883_v49  ;;  %4248 = vmatpush3.bf16.msk.msra.mxu0 %vm4676_vm3, %v4243_v44  ;;  %v3254_v44 = vld [vmem:[%s5811_s2 + $0x98] sm:$0xff] }
  0x1c   :  { %3702 = vmatmul.mubr.msk.f32.gmra.mrb[6].mxu1 %vm42_vm1, %v4892_v50  ;;  %4260 = vmatprep.subr.bf16.mxu0 %v4667_v3 }
  0x1d   :  { %3729 = vmatprep.mubr.msk.f32.mxu1 %vm42_vm1, %v4899_v51 }
  0x1e   :  { %3719 = vmatmul.mubr.msk.f32.gmra.mrb[8].mxu0 %vm42_vm1, %v4909_v52 }
  0x1f   :  { %3746 = vmatprep.mubr.msk.f32.mxu0 %vm42_vm1, %v4735_v19 }
  0x20   :  { %3730 = vmatmul.mubr.msk.f32.vlgmr.msra.gmra.mrb[8].mxu1 %vm42_vm1, %v4927_v55 }
  0x21   :  { %4252 = vmatpush3.bf16.msra.mxu1 %v4866_v47  ;;  %3732 = vmatprep.mubr.msk.f32.mxu1 %vm42_vm1, %v4937_v57 }
  0x22   :  { %3747 = vmatmul.mubr.msk.f32.vlgmr.msra.gmra.mrb[10].mxu0 %vm42_vm1, %v4746_v21  ;;  %4255 = vmatprep.subr.msk.bf16.mxu1 %vm4676_vm3, %v4253_v58 }
  0x23   :  { %4262 = vmatpush3.bf16.msra.mxu0 %v4667_v3  ;;  %3749 = vmatprep.mubr.msk.f32.mxu0 %vm42_vm1, %v4776_v29  ;;  %v4283_v3 = vpack.c.bf16 %v3185_v1, %v4723_v17  ;;  %v1820_v17 = vld [vmem:[%s5811_s2 + $0x18] sm:$0xff] }
  0x24   :  { %3733 = vmatmul.mubr.msk.f32.gmra.mrb[10].mxu1 %vm42_vm1, %v4951_v60  ;;  %4265 = vmatprep.subr.msk.bf16.mxu0 %vm4676_vm3, %v4263_v59 }
  0x25   :  { %3735 = vmatprep.mubr.msk.f32.mxu1 %vm42_vm1, %v4960_v61  ;;  %4258 = vmatpush3.bf16.msk.msra.mxu1 %vm4676_vm3, %v4253_v58 }
  0x26   :  { %3750 = vmatmul.mubr.msk.f32.gmra.mrb[12].mxu0 %vm42_vm1, %v4686_v8  ;;  %4270 = vmatprep.subr.bf16.mxu1 %v4700_v11 }
  0x27   :  { %3752 = vmatprep.mubr.msk.f32.mxu0 %vm42_vm1, %v4740_v20  ;;  %4268 = vmatpush3.bf16.msk.msra.mxu0 %vm4676_vm3, %v4263_v59  ;;  %v3264_v59 = vld [vmem:[%s5811_s2 + $0xe8] sm:$0xff] }
  0x28   :  { %3736 = vmatmul.mubr.msk.f32.gmra.mrb[12].mxu1 %vm42_vm1, %v4976_v62  ;;  %4280 = vmatprep.subr.bf16.mxu0 %v4718_v16 }
  0x29   :  { %3763 = vmatprep.mubr.msk.f32.mxu1 %vm42_vm1, %v4808_v35 }
  0x2a   :  { %3753 = vmatmul.mubr.msk.f32.gmra.mrb[14].mxu0 %vm42_vm1, %v3117_v63 }
  0x2b   :  { %3780 = vmatprep.mubr.msk.f32.mxu0 %vm42_vm1, %v4786_v31  ;;  %v1829_v31 = vld [vmem:[%s5811_s2 + $0x60] sm:$0xff] }
  0x2c   :  { %3764 = vmatmul.mubr.msk.f32.vlgmr.msra.gmra.mrb[14].mxu1 %vm42_vm1, %v4826_v38 }
  0x2d   :  { %4272 = vmatpush3.bf16.msra.mxu1 %v4700_v11  ;;  %3766 = vmatprep.mubr.msk.f32.mxu1 %vm42_vm1, %v4855_v45  ;;  %v3236_v11 = vld [vmem:[%s5809_s1 + $0xb8] sm:$0xf] }
  0x2e   :  { %3781 = vmatmul.mubr.msk.f32.vlgmr.msra.gmra.mrb[16].mxu0 %vm42_vm1, %v4832_v40  ;;  %4275 = vmatprep.subr.msk.bf16.mxu1 %vm4676_vm3, %v4273_v2 }
  0x2f   :  { %3783 = vmatprep.mubr.msk.f32.mxu0 %vm42_vm1, %v4846_v43  ;;  %4282 = vmatpush3.bf16.msra.mxu0 %v4718_v16  ;;  %v1819_v16 = vld [vmem:[%s5811_s2 + $0x10] sm:$0xff] }
  0x30   :  { %3767 = vmatmul.mubr.msk.f32.gmra.mrb[16].mxu1 %vm42_vm1, %v4864_v46  ;;  %4285 = vmatprep.subr.msk.bf16.mxu0 %vm4676_vm3, %v4283_v3  ;;  %v4323_v18 = vpack.c.bf16 %v1820_v17, %v1819_v16 }
  0x31   :  { %3769 = vmatprep.mubr.msk.f32.mxu1 %vm42_vm1, %v4892_v50  ;;  %4278 = vmatpush3.bf16.msk.msra.mxu1 %vm4676_vm3, %v4273_v2 }
  0x32   :  { %3784 = vmatmul.mubr.msk.f32.gmra.mrb[18].mxu0 %vm42_vm1, %v4874_v48  ;;  %4290 = vmatprep.subr.bf16.mxu1 %v4781_v30 }
  0x33   :  { %3786 = vmatprep.mubr.msk.f32.mxu0 %vm42_vm1, %v4883_v49  ;;  %4288 = vmatpush3.bf16.msk.msra.mxu0 %vm4676_vm3, %v4283_v3 }
  0x34   :  { %3770 = vmatmul.mubr.msk.f32.gmra.mrb[18].mxu1 %vm42_vm1, %v3134_v4  ;;  %4300 = vmatprep.subr.bf16.mxu0 %v4791_v32 }
  0x35   :  { %3797 = vmatprep.mubr.msk.f32.mxu1 %vm42_vm1, %v4899_v51  ;;  %v3259_v51 = vld [vmem:[%s5811_s2 + $0xc0] sm:$0xff] }
  0x36   :  { %3787 = vmatmul.mubr.msk.f32.gmra.mrb[20].mxu0 %vm42_vm1, %v4909_v52 }
  0x37   :  { %3814 = vmatprep.mubr.msk.f32.mxu0 %vm42_vm1, %v4735_v19  ;;  %v1821_v19 = vld [vmem:[%s5811_s2 + $0x20] sm:$0xff] }
  0x38   :  { %3798 = vmatmul.mubr.msk.f32.vlgmr.msra.gmra.mrb[20].mxu1 %vm42_vm1, %v4927_v55 }
  0x39   :  { %3800 = vmatprep.mubr.msk.f32.mxu1 %vm42_vm1, %v4937_v57  ;;  %4292 = vmatpush3.bf16.msra.mxu1 %v4781_v30 }
  0x3a   :  { %3815 = vmatmul.mubr.msk.f32.vlgmr.msra.gmra.mrb[22].mxu0 %vm42_vm1, %v4746_v21  ;;  %4295 = vmatprep.subr.msk.bf16.mxu1 %vm4676_vm3, %v4293_v9 }
  0x3b   :  { %3817 = vmatprep.mubr.msk.f32.mxu0 %vm42_vm1, %v4776_v29  ;;  %4302 = vmatpush3.bf16.msra.mxu0 %v4791_v32  ;;  %v1828_v29 = vld [vmem:[%s5811_s2 + $0x58] sm:$0xff]  ;;  %v1830_v32 = vld [vmem:[%s5811_s2 + $0x68] sm:$0xff] }
  0x3c   :  { %3801 = vmatmul.mubr.msk.f32.gmra.mrb[22].mxu1 %vm42_vm1, %v4951_v60  ;;  %4305 = vmatprep.subr.msk.bf16.mxu0 %vm4676_vm3, %v4303_v10  ;;  %v4339_v30 = vpack.c.bf16 %v1828_v29, %v1827_v28  ;;  %v4343_v33 = vpack.c.bf16 %v1830_v32, %v1829_v31 }
  0x3d   :  { %3803 = vmatprep.mubr.msk.f32.mxu1 %vm42_vm1, %v4960_v61  ;;  %4298 = vmatpush3.bf16.msk.msra.mxu1 %vm4676_vm3, %v4293_v9 }
  0x3e   :  { %3818 = vmatmul.mubr.msk.f32.gmra.mrb[24].mxu0 %vm42_vm1, %v4686_v8  ;;  %4310 = vmatprep.subr.bf16.mxu1 %v4866_v47  ;;  %v4313_v8 = vpack.c.bf16 %v3236_v11, %v4914_v53  ;;  %v3260_v53 = vld [vmem:[%s5811_s2 + $0xc8] sm:$0xff] }
  0x3f   :  { %3820 = vmatprep.mubr.msk.f32.mxu0 %vm42_vm1, %v4740_v20  ;;  %4308 = vmatpush3.bf16.msk.msra.mxu0 %vm4676_vm3, %v4303_v10  ;;  %v1822_v20 = vld [vmem:[%s5811_s2 + $0x28] sm:$0xff] }
  0x40   :  { %3804 = vmatmul.mubr.msk.f32.gmra.mrb[24].mxu1 %vm42_vm1, %v4976_v62  ;;  %4320 = vmatprep.subr.bf16.mxu0 %v4319_v15  ;;  %v4327_v21 = vpack.c.bf16 %v1822_v20, %v1821_v19 }
  0x41   :  { %3831 = vmatprep.mubr.msk.f32.mxu1 %vm42_vm1, %v4808_v35  ;;  %v3269_v35 = vld [vmem:[%s5811_s2 + $0xf0] sm:$0xff] }
  0x42   :  { %3821 = vmatmul.mubr.msk.f32.gmra.mrb[26].mxu0 %vm42_vm1, %v3117_v63  ;;  %v5179_v37 = vpack.c.bf16 %v3270_v36, %v3269_v35 }
  0x43   :  { %3848 = vmatprep.mubr.msk.f32.mxu0 %vm42_vm1, %v4832_v40 }
  0x44   :  { %3832 = vmatmul.mubr.msk.f32.vlgmr.msra.gmra.mrb[26].mxu1 %vm42_vm1, %v4826_v38  ;;  %v3250_v38 = vld [vmem:[%s5811_s2 + $0x78] sm:$0xff] }
  0x45   :  { %3834 = vmatprep.mubr.msk.f32.mxu1 %vm42_vm1, %v4855_v45  ;;  %4312 = vmatpush3.bf16.msra.mxu1 %v4866_v47  ;;  %v4347_v40 = vpack.c.bf16 %v3251_v39, %v3250_v38  ;;  %v3255_v45 = vld [vmem:[%s5811_s2 + $0xa0] sm:$0xff]  ;;  %v3256_v47 = vld [vmem:[%s5811_s2 + $0xa8] sm:$0xff] }
  0x46   :  { %3849 = vmatmul.mubr.msk.f32.vlgmr.msra.gmra.mrb[28].mxu0 %vm42_vm1, %v4846_v43  ;;  %4315 = vmatprep.subr.msk.bf16.mxu1 %vm4676_vm3, %v4313_v8  ;;  %v4351_v43 = vpack.c.bf16 %v3253_v42, %v3252_v41 }
  0x47   :  { %3851 = vmatprep.mubr.msk.f32.mxu0 %vm42_vm1, %v4874_v48  ;;  %4322 = vmatpush3.bf16.msra.mxu0 %v4319_v15  ;;  %v3257_v48 = vld [vmem:[%s5811_s2 + $0xb0] sm:$0xff] }
  0x48   :  { %3835 = vmatmul.mubr.msk.f32.gmra.mrb[28].mxu1 %vm42_vm1, %v4864_v46  ;;  %4324 = vmatprep.subr.bf16.mxu0 %v4323_v18  ;;  %v4355_v46 = vpack.c.bf16 %v3255_v45, %v3254_v44 }
  0x49   :  { %3837 = vmatprep.mubr.msk.f32.mxu1 %vm42_vm1, %v4892_v50  ;;  %4318 = vmatpush3.bf16.msk.msra.mxu1 %vm4676_vm3, %v4313_v8  ;;  %v3258_v50 = vld [vmem:[%s5811_s2 + $0xb8] sm:$0xff] }
  0x4a   :  { %3852 = vmatmul.mubr.msk.f32.gmra.mrb[30].mxu0 %vm42_vm1, %v4883_v49  ;;  %4348 = vmatprep.subr.bf16.mxu1 %v4347_v40  ;;  %v4359_v49 = vpack.c.bf16 %v3257_v48, %v3256_v47 }
  0x4b   :  { %3854 = vmatprep.mubr.msk.f32.mxu0 %vm42_vm1, %v4909_v52  ;;  %4326 = vmatpush3.bf16.msra.mxu0 %v4323_v18  ;;  %v4363_v52 = vpack.c.bf16 %v3259_v51, %v3258_v50 }
  0x4c   :  { %3838 = vmatmul.mubr.msk.f32.gmra.mrb[30].mxu1 %vm42_vm1, %v3134_v4  ;;  %4328 = vmatprep.subr.bf16.mxu0 %v4327_v21 }
  0x4d   :  { %3865 = vmatprep.mubr.msk.f32.mxu1 %vm42_vm1, %v4927_v55  ;;  %v4367_v55 = vpack.c.bf16 %v3261_v54, %v3260_v53 }
  0x4e   :  { %3855 = vmatmul.mubr.msk.f32.gmra.mrb[32].mxu0 %vm42_vm1, %v3215_v12 }
  0x4f   :  { %4330 = vmatpush3.bf16.msra.mxu0 %v4327_v21 }
  0x50   :  { %3866 = vmatmul.mubr.msk.f32.vlgmr.msra.gmra.mrb[32].mxu1 %vm42_vm1, %v4937_v57  ;;  %4332 = vmatprep.subr.bf16.mxu0 %v4331_v24  ;;  %v3263_v57 = vld [vmem:[%s5811_s2 + $0xe0] sm:$0xff] }
  0x51   :  { %3868 = vmatprep.mubr.msk.f32.mxu1 %vm42_vm1, %v4951_v60  ;;  %4350 = vmatpush3.bf16.msra.mxu1 %v4347_v40  ;;  %v4371_v58 = vpack.c.bf16 %v3263_v57, %v3262_v56  ;;  %v3288_v60 = vld [vmem:[%s5811_s2 + $0x168] sm:$0xff] }
  0x52   :  { %4352 = vmatprep.subr.bf16.mxu1 %v4351_v43 }
  0x53   :  { %4334 = vmatpush3.bf16.msra.mxu0 %v4331_v24 }
  0x54   :  { %3869 = vmatmul.mubr.msk.f32.gmra.mrb[34].mxu1 %vm42_vm1, %v4960_v61  ;;  %4336 = vmatprep.subr.bf16.mxu0 %v4335_v27  ;;  %v3289_v61 = vld [vmem:[%s5811_s2 + $0x170] sm:$0xff] }
  0x55   :  { %3871 = vmatprep.mubr.msk.f32.mxu1 %vm42_vm1, %v4976_v62  ;;  %4354 = vmatpush3.bf16.msra.mxu1 %v4351_v43  ;;  %v5233_v62 = vpack.c.bf16 %v3289_v61, %v3288_v60 }
  0x56   :  { %4356 = vmatprep.subr.bf16.mxu1 %v4355_v46 }
  0x57   :  { %4338 = vmatpush3.bf16.msra.mxu0 %v4335_v27 }
  0x58   :  { %3872 = vmatmul.mubr.msk.f32.gmra.mrb[36].mxu1 %vm42_vm1, %v3232_v7  ;;  %4340 = vmatprep.subr.bf16.mxu0 %v4339_v30 }
  0x59   :  { %4358 = vmatpush3.bf16.msra.mxu1 %v4355_v46 }
  0x5a   :  { %4360 = vmatprep.subr.bf16.mxu1 %v4359_v49 }
  0x5b   :  { %4342 = vmatpush3.bf16.msra.mxu0 %v4339_v30 }
  0x5c   :  { %4344 = vmatprep.subr.bf16.mxu0 %v4343_v33 }
  0x5d   :  { %4362 = vmatpush3.bf16.msra.mxu1 %v4359_v49 }
  0x5e   :  { %4364 = vmatprep.subr.bf16.mxu1 %v4363_v52 }
  0x5f   :  { %4346 = vmatpush3.bf16.msra.mxu0 %v4343_v33 }
  0x60   :  { %3902 = vmatprep.subr.mxu0 %v1831_v34 }
  0x61   :  { %4366 = vmatpush3.bf16.msra.mxu1 %v4363_v52 }
  0x62   :  { %4368 = vmatprep.subr.bf16.mxu1 %v4367_v55 }
  0x63   :  { %3903 = vmatpush3.msra.mxu0 %v1831_v34 }
  0x64   :  { %4376 = vmatprep.subr.bf16.mxu0 %v5179_v37 }
  0x65   :  { %4370 = vmatpush3.bf16.msra.mxu1 %v4367_v55 }
  0x66   :  { %4372 = vmatprep.subr.bf16.mxu1 %v4371_v58 }
  0x69   :  { %4374 = vmatpush3.bf16.msra.mxu1 %v4371_v58 }
  0x6a   :  { %3938 = vmatprep.subr.mxu1 %v3264_v59 }
  0x6d   :  { %3939 = vmatpush3.msra.mxu1 %v3264_v59 }
  0x6e   :  { %4404 = vmatprep.subr.bf16.mxu1 %v5233_v62 }
  0xdf   :  { %v3680_v63 = vpop.f32.mrb[0].mxu0  ;;  %v3686_v0 = vpop.f32.mrb[0].mxu1 }
  0xe0   :  { %162 = vst.msk [vmem:[#allocation2 + $0x8] sm:$0xff] %vm160_vm4, %v3680_v63  ;;  %166 = vst.msk [vmem:[#allocation2 + $0x28] sm:$0xff] %vm160_vm4, %v3686_v0  ;;  %v131_v1 = vpop.f32.mrb[1].mxu0  ;;  %v151_v2 = vpop.f32.mrb[1].mxu1 }
  0xe1   :  { %161 = vst.msk [vmem:[#allocation2] sm:$0xff] %vm160_vm4, %v131_v1  ;;  %165 = vst.msk [vmem:[#allocation2 + $0x20] sm:$0xff] %vm160_vm4, %v151_v2 }
  0xe3   :  { %v3683_v3 = vpop.f32.mrb[2].mxu0 }
  0xe4   :  { %164 = vst.msk [vmem:[#allocation2 + $0x18] sm:$0xff] %vm160_vm4, %v3683_v3  ;;  %v141_v4 = vpop.f32.mrb[3].mxu0 }
  0xe5   :  { %163 = vst.msk [vmem:[#allocation2 + $0x10] sm:$0xff] %vm160_vm4, %v141_v4 }
  0xe7   :  { %v3697_v5 = vpop.f32.mrb[2].mxu1  ;;  %v296_v6 = vld [vmem:[#allocation2 + $0x8] sm:$0xff] }
  0xe8   :  { %v302_v9 = vadd.f32 %v3697_v5, %v296_v6  ;;  %v266_v10 = vpop.f32.mrb[3].mxu1  ;;  %v295_v11 = vld [vmem:[#allocation2] sm:$0xff]  ;;  %v300_v22 = vld [vmem:[#allocation2 + $0x28] sm:$0xff] }
  0xe9   :  { %v301_v8 = vadd.f32 %v295_v11, %v266_v10  ;;  %v3714_v12 = vpop.f32.mrb[4].mxu0  ;;  %v299_v25 = vld [vmem:[#allocation2 + $0x20] sm:$0xff] }
  0xea   :  { %308 = vst.msk [vmem:[#allocation2 + $0x8] sm:$0xff] %vm160_vm4, %v302_v9  ;;  %v412_v7 = vpop.f32.mrb[5].mxu0 }
  0xeb   :  { %307 = vst.msk [vmem:[#allocation2] sm:$0xff] %vm160_vm4, %v301_v8  ;;  %v3700_v13 = vpop.f32.mrb[4].mxu1  ;;  %v298_v14 = vld [vmem:[#allocation2 + $0x18] sm:$0xff] }
  0xec   :  { %v304_v15 = vadd.f32 %v3700_v13, %v298_v14  ;;  %v276_v16 = vpop.f32.mrb[5].mxu1  ;;  %v297_v17 = vld [vmem:[#allocation2 + $0x10] sm:$0xff] }
  0xed   :  { %v303_v18 = vadd.f32 %v297_v17, %v276_v16  ;;  %v3717_v19 = vpop.f32.mrb[6].mxu0 }
  0xee   :  { %310 = vst.msk [vmem:[#allocation2 + $0x18] sm:$0xff] %vm160_vm4, %v304_v15  ;;  %v422_v20 = vpop.f32.mrb[7].mxu0 }
  0xef   :  { %309 = vst.msk [vmem:[#allocation2 + $0x10] sm:$0xff] %vm160_vm4, %v303_v18  ;;  %v3703_v21 = vpop.f32.mrb[6].mxu1 }
  0xf0   :  { %v306_v23 = vadd.f32 %v3703_v21, %v300_v22  ;;  %v286_v24 = vpop.f32.mrb[7].mxu1 }
  0xf1   :  { %v442_v26 = vld [vmem:[#allocation2 + $0x8] sm:$0xff]  ;;  %v305_v27 = vadd.f32 %v299_v25, %v286_v24  ;;  %v3720_v28 = vpop.f32.mrb[8].mxu0 }
  0xf2   :  { %v448_v29 = vadd.f32 %v3714_v12, %v442_v26  ;;  %v441_v30 = vld [vmem:[#allocation2] sm:$0xff]  ;;  %312 = vst.msk [vmem:[#allocation2 + $0x28] sm:$0xff] %vm160_vm4, %v306_v23  ;;  %v432_v31 = vpop.f32.mrb[9].mxu0 }
  0xf3   :  { %v447_v32 = vadd.f32 %v441_v30, %v412_v7  ;;  %311 = vst.msk [vmem:[#allocation2 + $0x20] sm:$0xff] %vm160_vm4, %v305_v27  ;;  %v3731_v33 = vpop.f32.mrb[8].mxu1 }
  0xf4   :  { %454 = vst.msk [vmem:[#allocation2 + $0x8] sm:$0xff] %vm160_vm4, %v448_v29  ;;  %v558_v34 = vpop.f32.mrb[9].mxu1 }
  0xf5   :  { %453 = vst.msk [vmem:[#allocation2] sm:$0xff] %vm160_vm4, %v447_v32  ;;  %v444_v35 = vld [vmem:[#allocation2 + $0x18] sm:$0xff]  ;;  %v3748_v36 = vpop.f32.mrb[10].mxu0 }
  0xf6   :  { %v450_v38 = vadd.f32 %v3717_v19, %v444_v35  ;;  %v443_v39 = vld [vmem:[#allocation2 + $0x10] sm:$0xff]  ;;  %v704_v40 = vpop.f32.mrb[11].mxu0 }
  0xf7   :  { %v449_v41 = vadd.f32 %v443_v39, %v422_v20  ;;  %v3734_v42 = vpop.f32.mrb[10].mxu1 }
  0xf8   :  { %456 = vst.msk [vmem:[#allocation2 + $0x18] sm:$0xff] %vm160_vm4, %v450_v38  ;;  %v568_v43 = vpop.f32.mrb[11].mxu1 }
  0xf9   :  { %455 = vst.msk [vmem:[#allocation2 + $0x10] sm:$0xff] %vm160_vm4, %v449_v41  ;;  %v446_v44 = vld [vmem:[#allocation2 + $0x28] sm:$0xff]  ;;  %v3751_v45 = vpop.f32.mrb[12].mxu0 }
  0xfa   :  { %v452_v46 = vadd.f32 %v3720_v28, %v446_v44  ;;  %v445_v47 = vld [vmem:[#allocation2 + $0x20] sm:$0xff]  ;;  %v714_v48 = vpop.f32.mrb[13].mxu0 }
  0xfb   :  { %v588_v49 = vld [vmem:[#allocation2 + $0x8] sm:$0xff]  ;;  %v451_v50 = vadd.f32 %v445_v47, %v432_v31  ;;  %v3737_v51 = vpop.f32.mrb[12].mxu1 }
  0xfc   :  { %458 = vst.msk [vmem:[#allocation2 + $0x28] sm:$0xff] %vm160_vm4, %v452_v46  ;;  %v594_v52 = vadd.f32 %v3731_v33, %v588_v49  ;;  %v587_v53 = vld [vmem:[#allocation2] sm:$0xff]  ;;  %v578_v54 = vpop.f32.mrb[13].mxu1 }
  0xfd   :  { %457 = vst.msk [vmem:[#allocation2 + $0x20] sm:$0xff] %vm160_vm4, %v451_v50  ;;  %v593_v55 = vadd.f32 %v587_v53, %v558_v34  ;;  %v3754_v56 = vpop.f32.mrb[14].mxu0 }
  0xfe   :  { %600 = vst.msk [vmem:[#allocation2 + $0x8] sm:$0xff] %vm160_vm4, %v594_v52  ;;  %v724_v57 = vpop.f32.mrb[15].mxu0 }
  0xff   :  { %599 = vst.msk [vmem:[#allocation2] sm:$0xff] %vm160_vm4, %v593_v55  ;;  %v590_v58 = vld [vmem:[#allocation2 + $0x18] sm:$0xff]  ;;  %v3765_v59 = vpop.f32.mrb[14].mxu1 }
 0x100   :  { %v596_v60 = vadd.f32 %v3734_v42, %v590_v58  ;;  %v589_v61 = vld [vmem:[#allocation2 + $0x10] sm:$0xff]  ;;  %v850_v63 = vpop.f32.mrb[15].mxu1 }
 0x101   :  { %v595_v0 = vadd.f32 %v589_v61, %v568_v43  ;;  %v3782_v1 = vpop.f32.mrb[16].mxu0 }
 0x102   :  { %602 = vst.msk [vmem:[#allocation2 + $0x18] sm:$0xff] %vm160_vm4, %v596_v60  ;;  %1024 = vst.msk [vmem:[#allocation3 + $0x8] sm:$0xff] %vm160_vm4, %v3782_v1  ;;  %v994_v2 = vpop.f32.mrb[17].mxu0 }
 0x103   :  { %601 = vst.msk [vmem:[#allocation2 + $0x10] sm:$0xff] %vm160_vm4, %v595_v0  ;;  %v592_v3 = vld [vmem:[#allocation2 + $0x28] sm:$0xff]  ;;  %v5259_v4 = vpop.f32.mrb[16].mxu1  ;;  %1023 = vst.msk [vmem:[#allocation3] sm:$0xff] %vm160_vm4, %v994_v2  ;;  %v5293_v0 = vld [vmem:[%s5812_s5] ss:$0 sm:$0xff] }
 0x104   :  { %v598_v5 = vadd.f32 %v3737_v51, %v592_v3  ;;  %v591_v6 = vld [vmem:[#allocation2 + $0x20] sm:$0xff]  ;;  %v5262_v9 = vpop.f32.mrb[17].mxu1 }
 0x105   :  { %v734_v10 = vld [vmem:[#allocation2 + $0x8] sm:$0xff]  ;;  %v597_v11 = vadd.f32 %v591_v6, %v578_v54  ;;  %v3785_v8 = vpop.f32.mrb[18].mxu0 }
 0x106   :  { %v740_v12 = vadd.f32 %v3748_v36, %v734_v10  ;;  %v733_v7 = vld [vmem:[#allocation2] sm:$0xff]  ;;  %604 = vst.msk [vmem:[#allocation2 + $0x28] sm:$0xff] %vm160_vm4, %v598_v5  ;;  %1026 = vst.msk [vmem:[#allocation3 + $0x18] sm:$0xff] %vm160_vm4, %v3785_v8  ;;  %v1004_v13 = vpop.f32.mrb[19].mxu0 }
 0x107   :  { %v739_v14 = vadd.f32 %v733_v7, %v704_v40  ;;  %603 = vst.msk [vmem:[#allocation2 + $0x20] sm:$0xff] %vm160_vm4, %v597_v11  ;;  %v5267_v15 = vpop.f32.mrb[18].mxu1  ;;  %1025 = vst.msk [vmem:[#allocation3 + $0x10] sm:$0xff] %vm160_vm4, %v1004_v13 }
 0x108   :  { %746 = vst.msk [vmem:[#allocation2 + $0x8] sm:$0xff] %vm160_vm4, %v740_v12  ;;  %v5271_v16 = vpop.f32.mrb[19].mxu1 }
 0x109   :  { %745 = vst.msk [vmem:[#allocation2] sm:$0xff] %vm160_vm4, %v739_v14  ;;  %v736_v17 = vld [vmem:[#allocation2 + $0x18] sm:$0xff]  ;;  %v3788_v19 = vpop.f32.mrb[20].mxu0 }
 0x10a   :  { %v1156_v18 = vld [vmem:[#allocation3 + $0x8] sm:$0xff]  ;;  %v742_v20 = vadd.f32 %v3751_v45, %v736_v17  ;;  %v735_v21 = vld [vmem:[#allocation2 + $0x10] sm:$0xff]  ;;  %1028 = vst.msk [vmem:[#allocation3 + $0x28] sm:$0xff] %vm160_vm4, %v3788_v19  ;;  %v1014_v23 = vpop.f32.mrb[21].mxu0 }
 0x10b   :  { %v1155_v22 = vld [vmem:[#allocation3] sm:$0xff]  ;;  %v741_v24 = vadd.f32 %v735_v21, %v714_v48  ;;  %v3799_v25 = vpop.f32.mrb[20].mxu1  ;;  %1027 = vst.msk [vmem:[#allocation3 + $0x20] sm:$0xff] %vm160_vm4, %v1014_v23 }
 0x10c   :  { %748 = vst.msk [vmem:[#allocation2 + $0x18] sm:$0xff] %vm160_vm4, %v742_v20  ;;  %v1162_v26 = vadd.f32 %v3799_v25, %v1156_v18  ;;  %v1126_v27 = vpop.f32.mrb[21].mxu1 }
 0x10d   :  { %747 = vst.msk [vmem:[#allocation2 + $0x10] sm:$0xff] %vm160_vm4, %v741_v24  ;;  %v738_v28 = vld [vmem:[#allocation2 + $0x28] sm:$0xff]  ;;  %v1161_v29 = vadd.f32 %v1155_v22, %v1126_v27  ;;  %v3816_v31 = vpop.f32.mrb[22].mxu0 }
 0x10e   :  { %v1158_v30 = vld [vmem:[#allocation3 + $0x18] sm:$0xff]  ;;  %v744_v32 = vadd.f32 %v3754_v56, %v738_v28  ;;  %v737_v33 = vld [vmem:[#allocation2 + $0x20] sm:$0xff]  ;;  %1168 = vst.msk [vmem:[#allocation3 + $0x8] sm:$0xff] %vm160_vm4, %v1162_v26  ;;  %v1270_v35 = vpop.f32.mrb[23].mxu0 }
 0x10f   :  { %v1157_v34 = vld [vmem:[#allocation3 + $0x10] sm:$0xff]  ;;  %v880_v36 = vld [vmem:[#allocation2 + $0x8] sm:$0xff]  ;;  %v743_v38 = vadd.f32 %v737_v33, %v724_v57  ;;  %1167 = vst.msk [vmem:[#allocation3] sm:$0xff] %vm160_vm4, %v1161_v29  ;;  %v3802_v39 = vpop.f32.mrb[22].mxu1 }
 0x110   :  { %750 = vst.msk [vmem:[#allocation2 + $0x28] sm:$0xff] %vm160_vm4, %v744_v32  ;;  %v886_v40 = vadd.f32 %v3765_v59, %v880_v36  ;;  %v879_v41 = vld [vmem:[#allocation2] sm:$0xff]  ;;  %v1164_v42 = vadd.f32 %v3802_v39, %v1158_v30  ;;  %v1136_v43 = vpop.f32.mrb[23].mxu1 }
 0x111   :  { %749 = vst.msk [vmem:[#allocation2 + $0x20] sm:$0xff] %vm160_vm4, %v743_v38  ;;  %v885_v44 = vadd.f32 %v879_v41, %v850_v63  ;;  %v1163_v45 = vadd.f32 %v1157_v34, %v1136_v43  ;;  %v1160_v46 = vld [vmem:[#allocation3 + $0x28] sm:$0xff]  ;;  %v3819_v47 = vpop.f32.mrb[24].mxu0 }
 0x112   :  { %892 = vst.msk [vmem:[#allocation2 + $0x8] sm:$0xff] %vm160_vm4, %v886_v40  ;;  %1170 = vst.msk [vmem:[#allocation3 + $0x18] sm:$0xff] %vm160_vm4, %v1164_v42  ;;  %v1159_v48 = vld [vmem:[#allocation3 + $0x20] sm:$0xff]  ;;  %v1280_v49 = vpop.f32.mrb[25].mxu0 }
 0x113   :  { %891 = vst.msk [vmem:[#allocation2] sm:$0xff] %vm160_vm4, %v885_v44  ;;  %v882_v50 = vld [vmem:[#allocation2 + $0x18] sm:$0xff]  ;;  %1169 = vst.msk [vmem:[#allocation3 + $0x10] sm:$0xff] %vm160_vm4, %v1163_v45  ;;  %v3805_v51 = vpop.f32.mrb[24].mxu1 }
 0x114   :  { %v888_v52 = vadd.f32 %v5259_v4, %v882_v50  ;;  %v881_v53 = vld [vmem:[#allocation2 + $0x10] sm:$0xff]  ;;  %v1166_v54 = vadd.f32 %v3805_v51, %v1160_v46  ;;  %v1146_v55 = vpop.f32.mrb[25].mxu1 }
 0x115   :  { %v887_v56 = vadd.f32 %v881_v53, %v5262_v9  ;;  %v1300_v57 = vld [vmem:[#allocation3 + $0x8] sm:$0xff]  ;;  %v1165_v58 = vadd.f32 %v1159_v48, %v1146_v55  ;;  %v3822_v59 = vpop.f32.mrb[26].mxu0 }
 0x116   :  { %894 = vst.msk [vmem:[#allocation2 + $0x18] sm:$0xff] %vm160_vm4, %v888_v52  ;;  %v1306_v60 = vadd.f32 %v3816_v31, %v1300_v57  ;;  %v1299_v61 = vld [vmem:[#allocation3] sm:$0xff]  ;;  %1172 = vst.msk [vmem:[#allocation3 + $0x28] sm:$0xff] %vm160_vm4, %v1166_v54  ;;  %v1290_v63 = vpop.f32.mrb[27].mxu0 }
 0x117   :  { %893 = vst.msk [vmem:[#allocation2 + $0x10] sm:$0xff] %vm160_vm4, %v887_v56  ;;  %v884_v1 = vld [vmem:[#allocation2 + $0x28] sm:$0xff]  ;;  %v1305_v2 = vadd.f32 %v1299_v61, %v1270_v35  ;;  %1171 = vst.msk [vmem:[#allocation3 + $0x20] sm:$0xff] %vm160_vm4, %v1165_v58  ;;  %v3833_v3 = vpop.f32.mrb[26].mxu1 }
 0x118   :  { %v890_v4 = vadd.f32 %v5267_v15, %v884_v1  ;;  %v883_v5 = vld [vmem:[#allocation2 + $0x20] sm:$0xff]  ;;  %1312 = vst.msk [vmem:[#allocation3 + $0x8] sm:$0xff] %vm160_vm4, %v1306_v60  ;;  %v1414_v6 = vpop.f32.mrb[27].mxu1 }
 0x119   :  { %v1752_v9 = vld [vmem:[#allocation2 + $0x8] sm:$0xff]  ;;  %v889_v10 = vadd.f32 %v883_v5, %v5271_v16  ;;  %1311 = vst.msk [vmem:[#allocation3] sm:$0xff] %vm160_vm4, %v1305_v2  ;;  %v5301_v8 = vpop.f32.mrb[28].mxu0  ;;  %v3271_v2 = vld [vmem:[%s5811_s2 + $0x100] sm:$0xff] }
 0x11a   :  { %v1302_v11 = vld [vmem:[#allocation3 + $0x18] sm:$0xff]  ;;  %v1765_v12 = vadd.f32 %v5293_v0, %v1752_v9  ;;  %v1751_v7 = vld [vmem:[#allocation2] sm:$0xff]  ;;  %896 = vst.msk [vmem:[#allocation2 + $0x28] sm:$0xff] %vm160_vm4, %v890_v4  ;;  %v5305_v15 = vpop.f32.mrb[29].mxu0 }
 0x11b   :  { %v1308_v13 = vadd.f32 %v3819_v47, %v1302_v11  ;;  %v1301_v14 = vld [vmem:[#allocation3 + $0x10] sm:$0xff]  ;;  %v1764_v17 = vadd.f32 %v5293_v0, %v1751_v7  ;;  %895 = vst.msk [vmem:[#allocation2 + $0x20] sm:$0xff] %vm160_vm4, %v889_v10  ;;  %v3836_v16 = vpop.f32.mrb[28].mxu1 }
 0x11c   :  { %v1307_v18 = vadd.f32 %v1301_v14, %v1280_v49  ;;  %4564 = vtanh.f32 %v1765_v12  ;;  %v1424_v19 = vpop.f32.mrb[29].mxu1  ;;  %v3273_v14 = vld [vmem:[%s5811_s2 + $0x110] sm:$0xff] }
 0x11d   :  { %1314 = vst.msk [vmem:[#allocation3 + $0x18] sm:$0xff] %vm160_vm4, %v1308_v13  ;;  %4566 = vtanh.f32 %v1764_v17  ;;  %v1754_v20 = vld [vmem:[#allocation2 + $0x18] sm:$0xff]  ;;  %v5311_v22 = vpop.f32.mrb[30].mxu0 }
 0x11e   :  { %1313 = vst.msk [vmem:[#allocation3 + $0x10] sm:$0xff] %vm160_vm4, %v1307_v18  ;;  %v1304_v21 = vld [vmem:[#allocation3 + $0x28] sm:$0xff]  ;;  %v1767_v23 = vadd.f32 %v5293_v0, %v1754_v20  ;;  %v1753_v24 = vld [vmem:[#allocation2 + $0x10] sm:$0xff]  ;;  %v5314_v27 = vpop.f32.mrb[31].mxu0 }
 0x11f   :  { %v1310_v25 = vadd.f32 %v3822_v59, %v1304_v21  ;;  %v1303_v26 = vld [vmem:[#allocation3 + $0x20] sm:$0xff]  ;;  %v1766_v28 = vadd.f32 %v5293_v0, %v1753_v24  ;;  %v1444_v29 = vld [vmem:[#allocation3 + $0x8] sm:$0xff]  ;;  %v3839_v31 = vpop.f32.mrb[30].mxu1 }
 0x120   :  { %v1309_v30 = vadd.f32 %v1303_v26, %v1290_v63  ;;  %4568 = vtanh.f32 %v1767_v23  ;;  %v1450_v32 = vadd.f32 %v3833_v3, %v1444_v29  ;;  %v1443_v33 = vld [vmem:[#allocation3] sm:$0xff]  ;;  %v1434_v34 = vpop.f32.mrb[31].mxu1  ;;  %v3272_v3 = vld [vmem:[%s5811_s2 + $0x108] sm:$0xff]  ;;  %v3275_v23 = vld [vmem:[%s5811_s2 + $0x120] sm:$0xff] }
 0x121   :  { %1316 = vst.msk [vmem:[#allocation3 + $0x28] sm:$0xff] %vm160_vm4, %v1310_v25  ;;  %4570 = vtanh.f32 %v1766_v28  ;;  %v1756_v35 = vld [vmem:[#allocation2 + $0x28] sm:$0xff]  ;;  %v1449_v36 = vadd.f32 %v1443_v33, %v1414_v6  ;;  %v3856_v38 = vpop.f32.mrb[32].mxu0  ;;  %v4379_v7 = vpack.c.bf16 %v3272_v3, %v3271_v2  ;;  %v3278_v33 = vld [vmem:[%s5811_s2 + $0x138] sm:$0xff] }
 0x122   :  { %1315 = vst.msk [vmem:[#allocation3 + $0x20] sm:$0xff] %vm160_vm4, %v1309_v30  ;;  %v1769_v39 = vadd.f32 %v5293_v0, %v1756_v35  ;;  %v1755_v40 = vld [vmem:[#allocation2 + $0x20] sm:$0xff]  ;;  %1456 = vst.msk [vmem:[#allocation3 + $0x8] sm:$0xff] %vm160_vm4, %v1450_v32  ;;  %v5321_v41 = vpop.f32.mrb[33].mxu0  ;;  %v3277_v32 = vld [vmem:[%s5811_s2 + $0x130] sm:$0xff] }
 0x123   :  { %v1768_v42 = vadd.f32 %v5293_v0, %v1755_v40  ;;  %1455 = vst.msk [vmem:[#allocation3] sm:$0xff] %vm160_vm4, %v1449_v36  ;;  %v3867_v44 = vpop.f32.mrb[32].mxu1  ;;  %v4391_v35 = vpack.c.bf16 %v3278_v33, %v3277_v32  ;;  %v3279_v40 = vld [vmem:[%s5811_s2 + $0x140] sm:$0xff] }
 0x124   :  { %v1446_v43 = vld [vmem:[#allocation3 + $0x18] sm:$0xff]  ;;  %4572 = vtanh.f32 %v1769_v39  ;;  %v5325_v47 = vpop.f32.mrb[33].mxu1 }
 0x125   :  { %v1452_v45 = vadd.f32 %v3836_v16, %v1446_v43  ;;  %v1445_v46 = vld [vmem:[#allocation3 + $0x10] sm:$0xff]  ;;  %4574 = vtanh.f32 %v1768_v42 }
 0x126   :  { %v1451_v48 = vadd.f32 %v1445_v46, %v1424_v19  ;;  %v4565_v49 = vpop.eup %4564 }
 0x127   :  { %1458 = vst.msk [vmem:[#allocation3 + $0x18] sm:$0xff] %vm160_vm4, %v1452_v45  ;;  %v4567_v50 = vpop.eup %4566  ;;  %1777 = vst.msk [vmem:[#allocation2 + $0x8] sm:$0xff] %vm160_vm4, %v4565_v49  ;;  %v5330_v52 = vpop.f32.mrb[34].mxu1  ;;  %v3282_v49 = vld [vmem:[%s5811_s2 + $0x158] sm:$0xff] }
 0x128   :  { %1457 = vst.msk [vmem:[#allocation3 + $0x10] sm:$0xff] %vm160_vm4, %v1451_v48  ;;  %v1448_v51 = vld [vmem:[#allocation3 + $0x28] sm:$0xff]  ;;  %1776 = vst.msk [vmem:[#allocation2] sm:$0xff] %vm160_vm4, %v4567_v50  ;;  %v5333_v55 = vpop.f32.mrb[35].mxu1  ;;  %v3281_v48 = vld [vmem:[%s5811_s2 + $0x150] sm:$0xff] }
 0x129   :  { %v1454_v53 = vadd.f32 %v3839_v31, %v1448_v51  ;;  %v1447_v54 = vld [vmem:[#allocation3 + $0x20] sm:$0xff]  ;;  %v1589_v56 = vld [vmem:[#allocation3 + $0x8] sm:$0xff] }
 0x12a   :  { %v1453_v57 = vadd.f32 %v1447_v54, %v1434_v34  ;;  %v4569_v58 = vpop.eup %4568  ;;  %v1595_v59 = vadd.f32 %v5301_v8, %v1589_v56  ;;  %v1588_v60 = vld [vmem:[#allocation3] sm:$0xff]  ;;  %v4399_v54 = vpack.c.bf16 %v3282_v49, %v3281_v48  ;;  %v3302_v48 = vld [vmem:[%s5811_s2 + $0x1d8] sm:$0xff] }
 0x12b   :  { %1460 = vst.msk [vmem:[#allocation3 + $0x28] sm:$0xff] %vm160_vm4, %v1454_v53  ;;  %v4571_v61 = vpop.eup %4570  ;;  %1779 = vst.msk [vmem:[#allocation2 + $0x18] sm:$0xff] %vm160_vm4, %v4569_v58  ;;  %v1594_v63 = vadd.f32 %v1588_v60, %v5305_v15  ;;  %v3873_v1 = vpop.f32.mrb[36].mxu1  ;;  %v3274_v15 = vld [vmem:[%s5811_s2 + $0x118] sm:$0xff]  ;;  %v3307_v60 = vld [vmem:[%s5811_s2 + $0x1e0] sm:$0xff] }
 0x12c   :  { %1459 = vst.msk [vmem:[#allocation3 + $0x20] sm:$0xff] %vm160_vm4, %v1453_v57  ;;  %1778 = vst.msk [vmem:[#allocation2 + $0x10] sm:$0xff] %vm160_vm4, %v4571_v61  ;;  %v1724_v4 = vpop.f32.mrb[37].mxu1  ;;  %v3308_v61 = vld [vmem:[%s5811_s2 + $0x1e8] sm:$0xff]  ;;  %v3326_v49 = vld [vmem:[%s5811_s2 + $0x258] sm:$0xff] }
 0x12d   :  { %1601 = vst.msk [vmem:[#allocation3 + $0x8] sm:$0xff] %vm160_vm4, %v1595_v59  ;;  %1600 = vst.msk [vmem:[#allocation3] sm:$0xff] %vm160_vm4, %v1594_v63  ;;  %v3283_v59 = vld [vmem:[%s5811_s2 + $0x160] sm:$0xff]  ;;  %v4431_v3 = vpack.c.bf16 %v3308_v61, %v3307_v60  ;;  %v3333_v60 = vld [vmem:[%s5811_s2 + $0x290] sm:$0xff] }
 0x12e   :  { %v1591_v5 = vld [vmem:[#allocation3 + $0x18] sm:$0xff]  ;;  %v4573_v6 = vpop.eup %4572 }
 0x12f   :  { %v1597_v9 = vadd.f32 %v5311_v22, %v1591_v5  ;;  %v1590_v10 = vld [vmem:[#allocation3 + $0x10] sm:$0xff]  ;;  %v4575_v11 = vpop.eup %4574  ;;  %1781 = vst.msk [vmem:[#allocation2 + $0x28] sm:$0xff] %vm160_vm4, %v4573_v6  ;;  %v1814_v13 = vld [vmem:[#allocation2 + $0x8] sm:$0xff]  ;;  %v4383_v22 = vpack.c.bf16 %v3274_v15, %v3273_v14  ;;  %v3313_v14 = vld [vmem:[%s5811_s2 + $0x210] sm:$0xff] }
 0x130   :  { %v1596_v8 = vadd.f32 %v1590_v10, %v5314_v27  ;;  %v1813_v12 = vld [vmem:[#allocation2] sm:$0xff]  ;;  %1780 = vst.msk [vmem:[#allocation2 + $0x20] sm:$0xff] %vm160_vm4, %v4575_v11  ;;  %v3314_v15 = vld [vmem:[%s5811_s2 + $0x218] sm:$0xff] }
 0x131   :  { %1603 = vst.msk [vmem:[#allocation3 + $0x18] sm:$0xff] %vm160_vm4, %v1597_v9  ;;  %3904 = vmatprep.mubr.msk.f32.mxu0 %vm160_vm4, %v1813_v12  ;;  %v3311_v6 = vld [vmem:[%s5811_s2 + $0x200] sm:$0xff]  ;;  %v3312_v9 = vld [vmem:[%s5811_s2 + $0x208] sm:$0xff] }
 0x132   :  { %1602 = vst.msk [vmem:[#allocation3 + $0x10] sm:$0xff] %vm160_vm4, %v1596_v8  ;;  %3905 = vmatmul.mubr.msk.f32.vlgmr.msra.gmra.mrb[34].mxu0 %vm160_vm4, %v1814_v13  ;;  %v1593_v17 = vld [vmem:[#allocation3 + $0x28] sm:$0xff]  ;;  %v4439_v11 = vpack.c.bf16 %v3312_v9, %v3311_v6  ;;  %v3291_v12 = vld [vmem:[%s5811_s2 + $0x180] sm:$0xff] }
 0x133   :  { %4378 = vmatpush3.bf16.msra.mxu0 %v5179_v37  ;;  %v1599_v18 = vadd.f32 %v3856_v38, %v1593_v17  ;;  %v1592_v16 = vld [vmem:[#allocation3 + $0x20] sm:$0xff]  ;;  %v5372_v26 = vld [vmem:[#allocation2 + $0x18] sm:$0xff]  ;;  %v3276_v37 = vld [vmem:[%s5811_s2 + $0x128] sm:$0xff] }
 0x134   :  { %v1734_v19 = vld [vmem:[#allocation3 + $0x8] sm:$0xff]  ;;  %v5364_v20 = vld [vmem:[#allocation2 + $0x10] sm:$0xff]  ;;  %4380 = vmatprep.subr.bf16.mxu0 %v4379_v7  ;;  %v1598_v21 = vadd.f32 %v1592_v16, %v5321_v41  ;;  %v4387_v29 = vpack.c.bf16 %v3276_v37, %v3275_v23  ;;  %v3280_v41 = vld [vmem:[%s5811_s2 + $0x148] sm:$0xff] }
 0x135   :  { %v1740_v24 = vadd.f32 %v3867_v44, %v1734_v19  ;;  %v1733_v25 = vld [vmem:[#allocation3] sm:$0xff]  ;;  %3907 = vmatprep.mubr.msk.f32.mxu0 %vm160_vm4, %v5364_v20  ;;  %1605 = vst.msk [vmem:[#allocation3 + $0x28] sm:$0xff] %vm160_vm4, %v1599_v18  ;;  %v3290_v8 = vld [vmem:[%s5811_s2 + $0x178] sm:$0xff]  ;;  %v3339_v6 = vld [vmem:[%s5811_s2 + $0x2c0] sm:$0xff] }
 0x136   :  { %v1739_v27 = vadd.f32 %v1733_v25, %v5325_v47  ;;  %3908 = vmatmul.mubr.msk.f32.gmra.mrb[36].mxu0 %vm160_vm4, %v5372_v26  ;;  %1604 = vst.msk [vmem:[#allocation3 + $0x20] sm:$0xff] %vm160_vm4, %v1598_v21  ;;  %v4395_v47 = vpack.c.bf16 %v3280_v41, %v3279_v40  ;;  %v4407_v19 = vpack.c.bf16 %v3291_v12, %v3290_v8  ;;  %v3293_v23 = vld [vmem:[%s5811_s2 + $0x190] sm:$0xff]  ;;  %v3298_v41 = vld [vmem:[%s5811_s2 + $0x1b8] sm:$0xff] }
 0x137   :  { %1746 = vst.msk [vmem:[#allocation3 + $0x8] sm:$0xff] %vm160_vm4, %v1740_v24  ;;  %4382 = vmatpush3.bf16.msra.mxu0 %v4379_v7  ;;  %3976 = vmatprep.mubr.msk.f32.mxu0 %vm160_vm4, %v1814_v13  ;;  %v5450_v13 = vld [vmem:[#allocation2 + $0x20] sm:$0xff]  ;;  %v4443_v21 = vpack.c.bf16 %v3314_v15, %v3313_v14  ;;  %v3316_v24 = vld [vmem:[%s5811_s2 + $0x228] sm:$0xff]  ;;  %v3346_v8 = vld [vmem:[%s5813_s3 + $0x50] sm:$0xff]  ;;  %v4603_v15 = vmov 0.0|0.0  }
 0x138   :  { %1745 = vst.msk [vmem:[#allocation3] sm:$0xff] %vm160_vm4, %v1739_v27  ;;  %v1736_v28 = vld [vmem:[#allocation3 + $0x18] sm:$0xff]  ;;  %4384 = vmatprep.subr.bf16.mxu0 %v4383_v22  ;;  %v3347_v12 = vld [vmem:[%s5813_s3 + $0x58] sm:$0xff] }
 0x139   :  { %v1742_v30 = vadd.f32 %v5330_v52, %v1736_v28  ;;  %v1735_v31 = vld [vmem:[#allocation3 + $0x10] sm:$0xff]  ;;  %v2599_v14 = vld [vmem:[%s5813_s3 + $0x8] sm:$0xff] }
 0x13a   :  { %v1741_v34 = vadd.f32 %v1735_v31, %v5333_v55  ;;  %v3318_v31 = vld [vmem:[%s5811_s2 + $0x238] sm:$0xff] }
 0x13b   :  { %1748 = vst.msk [vmem:[#allocation3 + $0x18] sm:$0xff] %vm160_vm4, %v1742_v30  ;;  %4386 = vmatpush3.bf16.msra.mxu0 %v4383_v22  ;;  %v3292_v22 = vld [vmem:[%s5811_s2 + $0x188] sm:$0xff]  ;;  %v3317_v30 = vld [vmem:[%s5811_s2 + $0x230] sm:$0xff] }
 0x13c   :  { %1747 = vst.msk [vmem:[#allocation3 + $0x10] sm:$0xff] %vm160_vm4, %v1741_v34  ;;  %4388 = vmatprep.subr.bf16.mxu0 %v4387_v29  ;;  %v1738_v36 = vld [vmem:[#allocation3 + $0x28] sm:$0xff]  ;;  %v4411_v27 = vpack.c.bf16 %v3293_v23, %v3292_v22  ;;  %v4451_v33 = vpack.c.bf16 %v3318_v31, %v3317_v30  ;;  %v3296_v34 = vld [vmem:[%s5811_s2 + $0x1a8] sm:$0xff]  ;;  %v2604_v31 = vld [vmem:[%s5813_s3 + $0x30] sm:$0xff] }
 0x13d   :  { %v1744_v38 = vadd.f32 %v3873_v1, %v1738_v36  ;;  %v1737_v39 = vld [vmem:[#allocation3 + $0x20] sm:$0xff]  ;;  %v3310_v1 = vld [vmem:[%s5811_s2 + $0x1f8] sm:$0xff]  ;;  %v3319_v36 = vld [vmem:[%s5811_s2 + $0x240] sm:$0xff] }
 0x13e   :  { %v1783_v42 = vld [vmem:[#allocation3 + $0x8] sm:$0xff]  ;;  %v1743_v43 = vadd.f32 %v1737_v39, %v1724_v4 }
 0x13f   :  { %v1796_v44 = vadd.f32 %v5293_v0, %v1783_v42  ;;  %v1782_v45 = vld [vmem:[#allocation3] sm:$0xff]  ;;  %4390 = vmatpush3.bf16.msra.mxu0 %v4387_v29  ;;  %1750 = vst.msk [vmem:[#allocation3 + $0x28] sm:$0xff] %vm160_vm4, %v1744_v38  ;;  %v3294_v29 = vld [vmem:[%s5811_s2 + $0x198] sm:$0xff]  ;;  %v3320_v38 = vld [vmem:[%s5811_s2 + $0x248] sm:$0xff] }
 0x140   :  { %v1795_v46 = vadd.f32 %v5293_v0, %v1782_v45  ;;  %4392 = vmatprep.subr.bf16.mxu0 %v4391_v35  ;;  %1749 = vst.msk [vmem:[#allocation3 + $0x20] sm:$0xff] %vm160_vm4, %v1743_v43  ;;  %v4455_v40 = vpack.c.bf16 %v3320_v38, %v3319_v36  ;;  %v3299_v42 = vld [vmem:[%s5811_s2 + $0x1c0] sm:$0xff]  ;;  %v3301_v45 = vld [vmem:[%s5811_s2 + $0x1d0] sm:$0xff]  ;;  %v2601_v22 = vld [vmem:[%s5813_s3 + $0x18] sm:$0xff] }
 0x141   :  { %4576 = vtanh.f32 %v1796_v44  ;;  %v4423_v43 = vpack.c.bf16 %v3299_v42, %v3298_v41  ;;  %v3300_v44 = vld [vmem:[%s5811_s2 + $0x1c8] sm:$0xff]  ;;  %v2606_v38 = vld [vmem:[%s5813_s3 + $0x40] sm:$0xff]  ;;  %v4605_v41 = vmov 0.0  }
 0x142   :  { %4578 = vtanh.f32 %v1795_v46  ;;  %v1785_v50 = vld [vmem:[#allocation3 + $0x18] sm:$0xff]  ;;  %v3321_v46 = vld [vmem:[%s5811_s2 + $0x250] sm:$0xff] }
 0x143   :  { %v1798_v51 = vadd.f32 %v5293_v0, %v1785_v50  ;;  %v1784_v52 = vld [vmem:[#allocation3 + $0x10] sm:$0xff]  ;;  %4394 = vmatpush3.bf16.msra.mxu0 %v4391_v35  ;;  %v3297_v35 = vld [vmem:[%s5811_s2 + $0x1b0] sm:$0xff] }
 0x144   :  { %v1797_v53 = vadd.f32 %v5293_v0, %v1784_v52  ;;  %4396 = vmatprep.subr.bf16.mxu0 %v4395_v47  ;;  %v4419_v39 = vpack.c.bf16 %v3297_v35, %v3296_v34  ;;  %v3327_v50 = vld [vmem:[%s5811_s2 + $0x260] sm:$0xff]  ;;  %v2324_v52 = vld [vmem:[#allocation2 + $0x28] sm:$0xff]  ;;  %v3354_v34 = vld [vmem:[%s5813_s3 + $0x90] sm:$0xff] }
 0x145   :  { %4580 = vtanh.f32 %v1798_v51  ;;  %v3329_v51 = vld [vmem:[%s5811_s2 + $0x270] sm:$0xff]  ;;  %v3355_v35 = vld [vmem:[%s5813_s3 + $0x98] sm:$0xff] }
 0x146   :  { %4582 = vtanh.f32 %v1797_v53  ;;  %v1787_v55 = vld [vmem:[#allocation3 + $0x28] sm:$0xff]  ;;  %v4459_v53 = vpack.c.bf16 %v3327_v50, %v3326_v49  ;;  %v4500_v36 = vpack.c.bf16 %v3355_v35, %v3354_v34 }
 0x147   :  { %v1800_v56 = vadd.f32 %v5293_v0, %v1787_v55  ;;  %v1786_v57 = vld [vmem:[#allocation3 + $0x20] sm:$0xff]  ;;  %4398 = vmatpush3.bf16.msra.mxu0 %v4395_v47  ;;  %v4427_v47 = vpack.c.bf16 %v3301_v45, %v3300_v44  ;;  %v3330_v55 = vld [vmem:[%s5811_s2 + $0x278] sm:$0xff] }
 0x148   :  { %v1799_v58 = vadd.f32 %v5293_v0, %v1786_v57  ;;  %4400 = vmatprep.subr.bf16.mxu0 %v4399_v54  ;;  %v3309_v0 = vld [vmem:[%s5811_s2 + $0x1f0] sm:$0xff] }
 0x149   :  { %4584 = vtanh.f32 %v1800_v56  ;;  %v4435_v4 = vpack.c.bf16 %v3310_v1, %v3309_v0  ;;  %v3331_v56 = vld [vmem:[%s5811_s2 + $0x280] sm:$0xff] }
 0x14a   :  { %4586 = vtanh.f32 %v1799_v58  ;;  %v4467_v57 = vpack.c.bf16 %v3331_v56, %v3330_v55  ;;  %v3335_v0 = vld [vmem:[%s5811_s2 + $0x2a0] sm:$0xff] }
 0x14b   :  { %v4577_v63 = vpop.eup %4576  ;;  %4402 = vmatpush3.bf16.msra.mxu0 %v4399_v54 }
 0x14c   :  { %v4579_v2 = vpop.eup %4578  ;;  %1808 = vst.msk [vmem:[#allocation3 + $0x8] sm:$0xff] %vm160_vm4, %v4577_v63  ;;  %3974 = vmatprep.subr.mxu0 %v3283_v59  ;;  %v3334_v63 = vld [vmem:[%s5811_s2 + $0x298] sm:$0xff] }
 0x14d   :  { %1807 = vst.msk [vmem:[#allocation3] sm:$0xff] %vm160_vm4, %v4579_v2  ;;  %v4475_v1 = vpack.c.bf16 %v3335_v0, %v3334_v63  ;;  %v3336_v2 = vld [vmem:[%s5811_s2 + $0x2a8] sm:$0xff] }
 0x14f   :  { %v4581_v5 = vpop.eup %4580  ;;  %3975 = vmatpush3.msra.mxu0 %v3283_v59  ;;  %v3332_v59 = vld [vmem:[%s5811_s2 + $0x288] sm:$0xff] }
 0x150   :  { %v4583_v10 = vpop.eup %4582  ;;  %1810 = vst.msk [vmem:[#allocation3 + $0x18] sm:$0xff] %vm160_vm4, %v4581_v5  ;;  %3977 = vmatmul.mubr.msk.f32.vlgmr.msra.gmra.mrb[38].mxu0 %vm160_vm4, %v5364_v20  ;;  %4432 = vmatprep.subr.bf16.mxu0 %v4431_v3  ;;  %v4471_v61 = vpack.c.bf16 %v3333_v60, %v3332_v59  ;;  %v3338_v5 = vld [vmem:[%s5811_s2 + $0x2b8] sm:$0xff] }
 0x151   :  { %1809 = vst.msk [vmem:[#allocation3 + $0x10] sm:$0xff] %vm160_vm4, %v4583_v10  ;;  %3979 = vmatprep.mubr.msk.f32.mxu0 %vm160_vm4, %v5372_v26  ;;  %4434 = vmatpush3.bf16.msra.mxu0 %v4431_v3  ;;  %v3337_v3 = vld [vmem:[%s5811_s2 + $0x2b0] sm:$0xff]  ;;  %v4483_v9 = vpack.c.bf16 %v3339_v6, %v3338_v5  ;;  %v3340_v10 = vld [vmem:[%s5811_s2 + $0x2c8] sm:$0xff] }
 0x152   :  { %4436 = vmatprep.subr.bf16.mxu0 %v4435_v4 }
 0x153   :  { %v4585_v7 = vpop.eup %4584  ;;  %v1935_v16 = vld [vmem:[#allocation3 + $0x8] sm:$0xff] }
 0x154   :  { %v4587_v17 = vpop.eup %4586  ;;  %1812 = vst.msk [vmem:[#allocation3 + $0x28] sm:$0xff] %vm160_vm4, %v4585_v7  ;;  %3980 = vmatmul.mubr.msk.f32.gmra.mrb[40].mxu0 %vm160_vm4, %v5450_v13  ;;  %v1934_v18 = vld [vmem:[#allocation3] sm:$0xff]  ;;  %v4488_v7 = vpack.c.bf16 %v3347_v12, %v3346_v8 }
 0x155   :  { %1811 = vst.msk [vmem:[#allocation3 + $0x20] sm:$0xff] %vm160_vm4, %v4587_v17  ;;  %4438 = vmatpush3.bf16.msra.mxu0 %v4435_v4  ;;  %4048 = vmatprep.mubr.msk.f32.mxu0 %vm160_vm4, %v5364_v20  ;;  %v3315_v20 = vld [vmem:[%s5811_s2 + $0x220] sm:$0xff]  ;;  %v4479_v4 = vpack.c.bf16 %v3337_v3, %v3336_v2 }
 0x156   :  { %3940 = vmatprep.mubr.msk.f32.mxu1 %vm160_vm4, %v1934_v18  ;;  %4440 = vmatprep.subr.bf16.mxu0 %v4439_v11  ;;  %v4447_v28 = vpack.c.bf16 %v3316_v24, %v3315_v20  ;;  %v3348_v18 = vld [vmem:[%s5813_s3 + $0x60] sm:$0xff]  ;;  %v3350_v20 = vld [vmem:[%s5813_s3 + $0x70] sm:$0xff]  ;;  %v3351_v24 = vld [vmem:[%s5813_s3 + $0x78] sm:$0xff] }
 0x157   :  { %3941 = vmatmul.mubr.msk.f32.vlgmr.msra.gmra.mrb[38].mxu1 %vm160_vm4, %v1935_v16  ;;  %v5481_v37 = vld [vmem:[#allocation3 + $0x18] sm:$0xff] }
 0x158   :  { %4406 = vmatpush3.bf16.msra.mxu1 %v5233_v62  ;;  %v5479_v25 = vld [vmem:[#allocation3 + $0x10] sm:$0xff] }
 0x159   :  { %4442 = vmatpush3.bf16.msra.mxu0 %v4439_v11  ;;  %3943 = vmatprep.mubr.msk.f32.mxu1 %vm160_vm4, %v5479_v25  ;;  %v3295_v62 = vld [vmem:[%s5811_s2 + $0x1a0] sm:$0xff] }
 0x15a   :  { %4408 = vmatprep.subr.bf16.mxu1 %v4407_v19  ;;  %4444 = vmatprep.subr.bf16.mxu0 %v4443_v21  ;;  %v4415_v32 = vpack.c.bf16 %v3295_v62, %v3294_v29  ;;  %v3352_v29 = vld [vmem:[%s5813_s3 + $0x80] sm:$0xff]  ;;  %v3353_v62 = vld [vmem:[%s5813_s3 + $0x88] sm:$0xff] }
 0x15b   :  { %3944 = vmatmul.mubr.msk.f32.gmra.mrb[40].mxu1 %vm160_vm4, %v5481_v37  ;;  %v2453_v11 = vld [vmem:[#allocation3 + $0x28] sm:$0xff]  ;;  %v4497_v30 = vpack.c.bf16 %v3353_v62, %v3352_v29 }
 0x15c   :  { %4410 = vmatpush3.bf16.msra.mxu1 %v4407_v19  ;;  %4012 = vmatprep.mubr.msk.f32.mxu1 %vm160_vm4, %v1935_v16  ;;  %v2195_v58 = vld [vmem:[#allocation3 + $0x20] sm:$0xff]  ;;  %v3349_v16 = vld [vmem:[%s5813_s3 + $0x68] sm:$0xff] }
 0x15d   :  { %4446 = vmatpush3.bf16.msra.mxu0 %v4443_v21  ;;  %4412 = vmatprep.subr.bf16.mxu1 %v4411_v27  ;;  %v4491_v19 = vpack.c.bf16 %v3349_v16, %v3348_v18  ;;  %v2600_v21 = vld [vmem:[%s5813_s3 + $0x10] sm:$0xff] }
 0x15e   :  { %4448 = vmatprep.subr.bf16.mxu0 %v4447_v28  ;;  %v4506_v23 = vpack.c.bf16 %v2601_v22, %v2600_v21 }
 0x160   :  { %4414 = vmatpush3.bf16.msra.mxu1 %v4411_v27  ;;  %v2603_v27 = vld [vmem:[%s5813_s3 + $0x28] sm:$0xff] }
 0x161   :  { %4450 = vmatpush3.bf16.msra.mxu0 %v4447_v28  ;;  %4416 = vmatprep.subr.bf16.mxu1 %v4415_v32 }
 0x162   :  { %4452 = vmatprep.subr.bf16.mxu0 %v4451_v33 }
 0x164   :  { %4418 = vmatpush3.bf16.msra.mxu1 %v4415_v32  ;;  %v2605_v32 = vld [vmem:[%s5813_s3 + $0x38] sm:$0xff] }
 0x165   :  { %4454 = vmatpush3.bf16.msra.mxu0 %v4451_v33  ;;  %4420 = vmatprep.subr.bf16.mxu1 %v4419_v39  ;;  %v4512_v33 = vpack.c.bf16 %v2605_v32, %v2604_v31 }
 0x166   :  { %4456 = vmatprep.subr.bf16.mxu0 %v4455_v40 }
 0x168   :  { %4422 = vmatpush3.bf16.msra.mxu1 %v4419_v39  ;;  %v2607_v39 = vld [vmem:[%s5813_s3 + $0x48] sm:$0xff] }
 0x169   :  { %4458 = vmatpush3.bf16.msra.mxu0 %v4455_v40  ;;  %4424 = vmatprep.subr.bf16.mxu1 %v4423_v43  ;;  %v4515_v40 = vpack.c.bf16 %v2607_v39, %v2606_v38 }
 0x16a   :  { %4046 = vmatprep.subr.mxu0 %v3321_v46 }
 0x16c   :  { %4426 = vmatpush3.bf16.msra.mxu1 %v4423_v43 }
 0x16d   :  { %4047 = vmatpush3.msra.mxu0 %v3321_v46  ;;  %4428 = vmatprep.subr.bf16.mxu1 %v4427_v47 }
 0x16e   :  { %4049 = vmatmul.mubr.msk.f32.vlgmr.msra.gmra.mrb[42].mxu0 %vm160_vm4, %v5372_v26  ;;  %v3328_v26 = vld [vmem:[%s5811_s2 + $0x268] sm:$0xff]  ;;  %4487 = vmatprep.subr.bf16.mxu0 %v4603_v15 }
 0x16f   :  { %4051 = vmatprep.mubr.msk.f32.mxu0 %vm160_vm4, %v5450_v13  ;;  %v4463_v54 = vpack.c.bf16 %v3329_v51, %v3328_v26  ;;  %v2598_v13 = vld [vmem:[%s5813_s3] sm:$0xff]  ;;  %4489 = vmatpush3.bf16.msra.mxu0 %v4488_v7 }
 0x170   :  { %4430 = vmatpush3.bf16.msra.mxu1 %v4427_v47  ;;  %v4503_v17 = vpack.c.bf16 %v2599_v14, %v2598_v13  ;;  %4490 = vmatprep.subr.bf16.mxu0 %v4603_v15 }
 0x171   :  { %4010 = vmatprep.subr.mxu1 %v3302_v48 }
 0x172   :  { %4052 = vmatmul.mubr.msk.f32.gmra.mrb[44].mxu0 %vm160_vm4, %v2324_v52 }
 0x173   :  { %4492 = vmatpush3.bf16.msra.mxu0 %v4491_v19  ;;  %4110 = vmatprep.mubr.msk.f32.mxu0 %vm4604_vm5, %v4605_v41 }
 0x174   :  { %4011 = vmatpush3.msra.mxu1 %v3302_v48  ;;  %4493 = vmatprep.subr.bf16.mxu0 %v4603_v15 }
 0x175   :  { %4013 = vmatmul.mubr.msk.f32.vlgmr.msra.gmra.mrb[42].mxu1 %vm160_vm4, %v5479_v25  ;;  %4460 = vmatprep.subr.bf16.mxu1 %v4459_v53 }
 0x176   :  { %4015 = vmatprep.mubr.msk.f32.mxu1 %vm160_vm4, %v5481_v37  ;;  %4462 = vmatpush3.bf16.msra.mxu1 %v4459_v53 }
 0x177   :  { %4464 = vmatprep.subr.bf16.mxu1 %v4463_v54 }
 0x179   :  { %4016 = vmatmul.mubr.msk.f32.gmra.mrb[44].mxu1 %vm160_vm4, %v2195_v58 }
 0x17a   :  { %4466 = vmatpush3.bf16.msra.mxu1 %v4463_v54  ;;  %4084 = vmatprep.mubr.msk.f32.mxu1 %vm160_vm4, %v5479_v25  ;;  %v4494_v25 = vpack.c.bf16 %v3351_v24, %v3350_v20 }
 0x17b   :  { %4468 = vmatprep.subr.bf16.mxu1 %v4467_v57 }
 0x17c   :  { %4495 = vmatpush3.bf16.msra.mxu0 %v4494_v25 }
 0x17d   :  { %4496 = vmatprep.subr.bf16.mxu0 %v4603_v15 }
 0x17e   :  { %4470 = vmatpush3.bf16.msra.mxu1 %v4467_v57 }
 0x17f   :  { %4472 = vmatprep.subr.bf16.mxu1 %v4471_v61 }
 0x180   :  { %4498 = vmatpush3.bf16.msra.mxu0 %v4497_v30 }
 0x181   :  { %4499 = vmatprep.subr.bf16.mxu0 %v4603_v15 }
 0x182   :  { %4474 = vmatpush3.bf16.msra.mxu1 %v4471_v61 }
 0x183   :  { %4476 = vmatprep.subr.bf16.mxu1 %v4475_v1 }
 0x184   :  { %4501 = vmatpush3.bf16.msra.mxu0 %v4500_v36 }
 0x185   :  { %4517 = vmatprep.subr.bf16.mxu0 %v4603_v15 }
 0x186   :  { %4478 = vmatpush3.bf16.msra.mxu1 %v4475_v1 }
 0x187   :  { %4480 = vmatprep.subr.bf16.mxu1 %v4479_v4 }
 0x18a   :  { %4482 = vmatpush3.bf16.msra.mxu1 %v4479_v4 }
 0x18b   :  { %4484 = vmatprep.subr.bf16.mxu1 %v4483_v9 }
 0x18e   :  { %4486 = vmatpush3.bf16.msra.mxu1 %v4483_v9 }
 0x18f   :  { %4082 = vmatprep.subr.mxu1 %v3340_v10 }
 0x192   :  { %4083 = vmatpush3.msra.mxu1 %v3340_v10 }
 0x193   :  { %4085 = vmatmul.mubr.msk.f32.vlgmr.msra.gmra.mrb[46].mxu1 %vm160_vm4, %v5481_v37  ;;  %4502 = vmatprep.subr.bf16.mxu1 %v4603_v15  ;;  %v2602_v37 = vld [vmem:[%s5813_s3 + $0x20] sm:$0xff] }
 0x194   :  { %4087 = vmatprep.mubr.msk.f32.mxu1 %vm160_vm4, %v2195_v58  ;;  %4504 = vmatpush3.bf16.msra.mxu1 %v4503_v17  ;;  %v4509_v28 = vpack.c.bf16 %v2603_v27, %v2602_v37 }
 0x195   :  { %4505 = vmatprep.subr.bf16.mxu1 %v4603_v15 }
 0x197   :  { %4088 = vmatmul.mubr.msk.f32.gmra.mrb[48].mxu1 %vm160_vm4, %v2453_v11 }
 0x198   :  { %4507 = vmatpush3.bf16.msra.mxu1 %v4506_v23  ;;  %4133 = vmatprep.mubr.msk.f32.mxu1 %vm4604_vm5, %v4605_v41 }
 0x199   :  { %4508 = vmatprep.subr.bf16.mxu1 %v4603_v15 }
 0x19c   :  { %4510 = vmatpush3.bf16.msra.mxu1 %v4509_v28 }
 0x19d   :  { %4511 = vmatprep.subr.bf16.mxu1 %v4603_v15 }
 0x1a0   :  { %4513 = vmatpush3.bf16.msra.mxu1 %v4512_v33 }
 0x1a1   :  { %4514 = vmatprep.subr.bf16.mxu1 %v4603_v15 }
 0x1a4   :  { %4516 = vmatpush3.bf16.msra.mxu1 %v4515_v40 }
 0x1a5   :  { %4532 = vmatprep.subr.bf16.mxu1 %v4603_v15 }
 0x205   :  { %v3906_v42 = vpop.f32.mrb[34].mxu0 }
 0x206   :  { %1931 = vst.msk [vmem:[#allocation4 + $0x8] sm:$0xff] %vm1929_vm6, %v3906_v42  ;;  %v1910_v43 = vpop.f32.mrb[35].mxu0 }
 0x207   :  { %1930 = vst.msk [vmem:[#allocation4] sm:$0xff] %vm1929_vm6, %v1910_v43 }
 0x209   :  { %v3909_v44 = vpop.f32.mrb[36].mxu0 }
 0x20a   :  { %1933 = vst.msk [vmem:[#allocation4 + $0x18] sm:$0xff] %vm1929_vm6, %v3909_v44  ;;  %v1920_v45 = vpop.f32.mrb[37].mxu0  ;;  %v3345_v44 = vld [vmem:[%s5814_s6] ss:$0 sm:$0xff] }
 0x20b   :  { %1932 = vst.msk [vmem:[#allocation4 + $0x10] sm:$0xff] %vm1929_vm6, %v1920_v45 }
 0x20d   :  { %v2052_v26 = vld [vmem:[#allocation4 + $0x8] sm:$0xff] }
 0x20e   :  { %v2051_v53 = vld [vmem:[#allocation4] sm:$0xff] }
 0x211   :  { %v2054_v56 = vld [vmem:[#allocation4 + $0x18] sm:$0xff] }
 0x212   :  { %v2053_v59 = vld [vmem:[#allocation4 + $0x10] sm:$0xff] }
 0x223   :  { %v3978_v46 = vpop.f32.mrb[38].mxu0 }
 0x224   :  { %v2161_v47 = vpop.f32.mrb[39].mxu0 }
 0x227   :  { %v3981_v48 = vpop.f32.mrb[40].mxu0 }
 0x228   :  { %v2171_v49 = vpop.f32.mrb[41].mxu0 }
 0x22a   :  { %v3942_v50 = vpop.f32.mrb[38].mxu1 }
 0x22b   :  { %v2056_v51 = vadd.f32 %v3942_v50, %v2052_v26  ;;  %v2032_v52 = vpop.f32.mrb[39].mxu1  ;;  %v3359_v50 = vld [vmem:[%s5813_s3 + $0xa8] sm:$0xff]  ;;  %v3369_v26 = vld [vmem:[%s5813_s3 + $0xf0] sm:$0xff] }
 0x22c   :  { %v2055_v54 = vadd.f32 %v2051_v53, %v2032_v52 }
 0x22d   :  { %2060 = vst.msk [vmem:[#allocation4 + $0x8] sm:$0xff] %vm1929_vm6, %v2056_v51  ;;  %v3370_v51 = vld [vmem:[%s5813_s3 + $0xf8] sm:$0xff] }
 0x22e   :  { %2059 = vst.msk [vmem:[#allocation4] sm:$0xff] %vm1929_vm6, %v2055_v54  ;;  %v3945_v55 = vpop.f32.mrb[40].mxu1  ;;  %v4533_v53 = vpack.c.bf16 %v3370_v51, %v3369_v26  ;;  %v3360_v54 = vld [vmem:[%s5813_s3 + $0xb0] sm:$0xff] }
 0x22f   :  { %v2058_v57 = vadd.f32 %v3945_v55, %v2054_v56  ;;  %v2042_v58 = vpop.f32.mrb[41].mxu1  ;;  %v3361_v55 = vld [vmem:[%s5813_s3 + $0xb8] sm:$0xff] }
 0x230   :  { %v2057_v60 = vadd.f32 %v2053_v59, %v2042_v58  ;;  %v3372_v58 = vld [vmem:[%s5813_s3 + $0x108] sm:$0xff] }
 0x231   :  { %2062 = vst.msk [vmem:[#allocation4 + $0x18] sm:$0xff] %vm1929_vm6, %v2058_v57  ;;  %v3371_v57 = vld [vmem:[%s5813_s3 + $0x100] sm:$0xff] }
 0x232   :  { %2061 = vst.msk [vmem:[#allocation4 + $0x10] sm:$0xff] %vm1929_vm6, %v2057_v60  ;;  %v4521_v60 = vpack.c.bf16 %v3361_v55, %v3360_v54 }
 0x234   :  { %v2181_v61 = vld [vmem:[#allocation4 + $0x8] sm:$0xff] }
 0x235   :  { %v2185_v63 = vadd.f32 %v3978_v46, %v2181_v61  ;;  %v2180_v0 = vld [vmem:[#allocation4] sm:$0xff] }
 0x236   :  { %v2184_v1 = vadd.f32 %v2180_v0, %v2161_v47  ;;  %v3362_v0 = vld [vmem:[%s5813_s3 + $0xc0] sm:$0xff] }
 0x237   :  { %2189 = vst.msk [vmem:[#allocation4 + $0x8] sm:$0xff] %vm1929_vm6, %v2185_v63  ;;  %v4536_v63 = vpack.c.bf16 %v3372_v58, %v3371_v57 }
 0x238   :  { %2188 = vst.msk [vmem:[#allocation4] sm:$0xff] %vm1929_vm6, %v2184_v1  ;;  %v2183_v2 = vld [vmem:[#allocation4 + $0x18] sm:$0xff]  ;;  %v3363_v1 = vld [vmem:[%s5813_s3 + $0xc8] sm:$0xff] }
 0x239   :  { %v2187_v3 = vadd.f32 %v3981_v48, %v2183_v2  ;;  %v2182_v4 = vld [vmem:[#allocation4 + $0x10] sm:$0xff] }
 0x23a   :  { %v2186_v5 = vadd.f32 %v2182_v4, %v2171_v49  ;;  %v3358_v49 = vld [vmem:[%s5813_s3 + $0xa0] sm:$0xff]  ;;  %v3374_v4 = vld [vmem:[%s5813_s3 + $0x118] sm:$0xff] }
 0x23b   :  { %2191 = vst.msk [vmem:[#allocation4 + $0x18] sm:$0xff] %vm1929_vm6, %v2187_v3  ;;  %v4518_v52 = vpack.c.bf16 %v3359_v50, %v3358_v49  ;;  %v3373_v3 = vld [vmem:[%s5813_s3 + $0x110] sm:$0xff] }
 0x23c   :  { %2190 = vst.msk [vmem:[#allocation4 + $0x10] sm:$0xff] %vm1929_vm6, %v2186_v5 }
 0x23e   :  { %v2310_v12 = vld [vmem:[#allocation4 + $0x8] sm:$0xff] }
 0x23f   :  { %v2309_v14 = vld [vmem:[#allocation4] sm:$0xff] }
 0x241   :  { %v4050_v6 = vpop.f32.mrb[42].mxu0 }
 0x242   :  { %v2419_v9 = vpop.f32.mrb[43].mxu0  ;;  %v2312_v16 = vld [vmem:[#allocation4 + $0x18] sm:$0xff] }
 0x243   :  { %v2311_v22 = vld [vmem:[#allocation4 + $0x10] sm:$0xff] }
 0x245   :  { %v4053_v10 = vpop.f32.mrb[44].mxu0 }
 0x246   :  { %v2429_v11 = vpop.f32.mrb[45].mxu0 }
 0x248   :  { %v4014_v8 = vpop.f32.mrb[42].mxu1 }
 0x249   :  { %v2314_v7 = vadd.f32 %v4014_v8, %v2310_v12  ;;  %v2290_v13 = vpop.f32.mrb[43].mxu1  ;;  %v3365_v8 = vld [vmem:[%s5813_s3 + $0xd8] sm:$0xff]  ;;  %v3375_v12 = vld [vmem:[%s5813_s3 + $0x120] sm:$0xff] }
 0x24a   :  { %v2313_v17 = vadd.f32 %v2309_v14, %v2290_v13 }
 0x24b   :  { %2318 = vst.msk [vmem:[#allocation4 + $0x8] sm:$0xff] %vm1929_vm6, %v2314_v7  ;;  %v3376_v7 = vld [vmem:[%s5813_s3 + $0x128] sm:$0xff] }
 0x24c   :  { %2317 = vst.msk [vmem:[#allocation4] sm:$0xff] %vm1929_vm6, %v2313_v17  ;;  %v4017_v18 = vpop.f32.mrb[44].mxu1  ;;  %v4542_v14 = vpack.c.bf16 %v3376_v7, %v3375_v12  ;;  %v3366_v17 = vld [vmem:[%s5813_s3 + $0xe0] sm:$0xff] }
 0x24d   :  { %v2316_v19 = vadd.f32 %v4017_v18, %v2312_v16  ;;  %v2300_v21 = vpop.f32.mrb[45].mxu1  ;;  %v3367_v18 = vld [vmem:[%s5813_s3 + $0xe8] sm:$0xff]  ;;  %v3377_v16 = vld [vmem:[%s5813_s3 + $0x130] sm:$0xff] }
 0x24e   :  { %v2315_v23 = vadd.f32 %v2311_v22, %v2300_v21  ;;  %v4530_v21 = vpack.c.bf16 %v3367_v18, %v3366_v17 }
 0x24f   :  { %2320 = vst.msk [vmem:[#allocation4 + $0x18] sm:$0xff] %vm1929_vm6, %v2316_v19  ;;  %v3378_v19 = vld [vmem:[%s5813_s3 + $0x138] sm:$0xff] }
 0x250   :  { %2319 = vst.msk [vmem:[#allocation4 + $0x10] sm:$0xff] %vm1929_vm6, %v2315_v23  ;;  %v4545_v22 = vpack.c.bf16 %v3378_v19, %v3377_v16 }
 0x252   :  { %v2439_v20 = vld [vmem:[#allocation4 + $0x8] sm:$0xff] }
 0x253   :  { %v2443_v24 = vadd.f32 %v4050_v6, %v2439_v20  ;;  %v2438_v25 = vld [vmem:[#allocation4] sm:$0xff]  ;;  %v4524_v6 = vpack.c.bf16 %v3363_v1, %v3362_v0 }
 0x254   :  { %v2442_v37 = vadd.f32 %v2438_v25, %v2419_v9  ;;  %v2945_v25 = vld [vmem:[%s5815_s4 + $0x8] sm:$0xff] }
 0x255   :  { %2447 = vst.msk [vmem:[#allocation4 + $0x8] sm:$0xff] %vm1929_vm6, %v2443_v24  ;;  %v2944_v24 = vld [vmem:[%s5815_s4] sm:$0xff] }
 0x256   :  { %2446 = vst.msk [vmem:[#allocation4] sm:$0xff] %vm1929_vm6, %v2442_v37  ;;  %v2441_v27 = vld [vmem:[#allocation4 + $0x18] sm:$0xff]  ;;  %v4548_v37 = vpack.c.bf16 %v2945_v25, %v2944_v24 }
 0x257   :  { %v2445_v28 = vadd.f32 %v4053_v10, %v2441_v27  ;;  %v2440_v29 = vld [vmem:[#allocation4 + $0x10] sm:$0xff]  ;;  %v4539_v10 = vpack.c.bf16 %v3374_v4, %v3373_v3 }
 0x258   :  { %v2444_v62 = vadd.f32 %v2440_v29, %v2429_v11  ;;  %v3364_v11 = vld [vmem:[%s5813_s3 + $0xd0] sm:$0xff] }
 0x259   :  { %2449 = vst.msk [vmem:[#allocation4 + $0x18] sm:$0xff] %vm1929_vm6, %v2445_v28  ;;  %v4527_v13 = vpack.c.bf16 %v3365_v8, %v3364_v11  ;;  %v2946_v27 = vld [vmem:[%s5815_s4 + $0x10] sm:$0xff]  ;;  %v2947_v28 = vld [vmem:[%s5815_s4 + $0x18] sm:$0xff] }
 0x25a   :  { %2448 = vst.msk [vmem:[#allocation4 + $0x10] sm:$0xff] %vm1929_vm6, %v2444_v62  ;;  %v4551_v29 = vpack.c.bf16 %v2947_v28, %v2946_v27  ;;  %v2948_v62 = vld [vmem:[%s5815_s4 + $0x20] sm:$0xff] }
 0x25c   :  { %v2568_v31 = vld [vmem:[#allocation4 + $0x8] sm:$0xff] }
 0x25d   :  { %v2567_v34 = vld [vmem:[#allocation4] sm:$0xff] }
 0x260   :  { %v2570_v38 = vld [vmem:[#allocation4 + $0x18] sm:$0xff] }
 0x261   :  { %v2569_v42 = vld [vmem:[#allocation4 + $0x10] sm:$0xff] }
 0x266   :  { %v4086_v30 = vpop.f32.mrb[46].mxu1 }
 0x267   :  { %v2572_v32 = vadd.f32 %v4086_v30, %v2568_v31  ;;  %v2548_v33 = vpop.f32.mrb[47].mxu1  ;;  %v2949_v30 = vld [vmem:[%s5815_s4 + $0x28] sm:$0xff] }
 0x268   :  { %v2571_v35 = vadd.f32 %v2567_v34, %v2548_v33  ;;  %v4554_v31 = vpack.c.bf16 %v2949_v30, %v2948_v62 }
 0x269   :  { %2576 = vst.msk [vmem:[#allocation4 + $0x8] sm:$0xff] %vm1929_vm6, %v2572_v32  ;;  %v2950_v32 = vld [vmem:[%s5815_s4 + $0x30] sm:$0x3] }
 0x26a   :  { %2575 = vst.msk [vmem:[#allocation4] sm:$0xff] %vm1929_vm6, %v2571_v35  ;;  %v4089_v36 = vpop.f32.mrb[48].mxu1 }
 0x26b   :  { %v2574_v39 = vadd.f32 %v4089_v36, %v2570_v38  ;;  %v2558_v40 = vpop.f32.mrb[49].mxu1 }
 0x26c   :  { %v2573_v43 = vadd.f32 %v2569_v42, %v2558_v40 }
 0x26d   :  { %2578 = vst.msk [vmem:[#allocation4 + $0x18] sm:$0xff] %vm1929_vm6, %v2574_v39 }
 0x26e   :  { %2577 = vst.msk [vmem:[#allocation4 + $0x10] sm:$0xff] %vm1929_vm6, %v2573_v43 }
 0x270   :  { %v2580_v45 = vld [vmem:[#allocation4 + $0x8] sm:$0xff] }
 0x271   :  { %v2591_v46 = vadd.f32 %v3345_v44, %v2580_v45  ;;  %v2579_v47 = vld [vmem:[#allocation4] sm:$0xff] }
 0x272   :  { %v2590_v48 = vadd.f32 %v3345_v44, %v2579_v47  ;;  %v3381_v47 = vld [vmem:[%s5817_s8] ss:$0 sm:$0xff] }
 0x273   :  { %4588 = vtanh.f32 %v2591_v46 }
 0x274   :  { %4590 = vtanh.f32 %v2590_v48  ;;  %v2582_v2 = vld [vmem:[#allocation4 + $0x18] sm:$0xff] }
 0x275   :  { %v2581_v61 = vld [vmem:[#allocation4 + $0x10] sm:$0xff]  ;;  %v2593_v9 = vadd.f32 %v3345_v44, %v2582_v2 }
 0x276   :  { %v2592_v5 = vadd.f32 %v3345_v44, %v2581_v61 }
 0x278   :  { %4592 = vtanh.f32 %v2592_v5 }
 0x279   :  { %4594 = vtanh.f32 %v2593_v9 }
 0x27d   :  { %v4589_v56 = vpop.eup %4588 }
 0x27e   :  { %v4591_v59 = vpop.eup %4590  ;;  %4111 = vmatmul.mubr.msk.f32.vlgmr.msra.gmra.mrb[46].mxu0 %vm1929_vm6, %v4589_v56 }
 0x27f   :  { %4519 = vmatpush3.bf16.msra.mxu0 %v4518_v52  ;;  %4134 = vmatmul.mubr.msk.f32.vlgmr.msra.gmra.mrb[50].mxu1 %vm1929_vm6, %v4591_v59 }
 0x280   :  { %4534 = vmatpush3.bf16.msra.mxu1 %v4533_v53  ;;  %4520 = vmatprep.subr.bf16.mxu0 %v4603_v15 }
 0x281   :  { %4535 = vmatprep.subr.bf16.mxu1 %v4603_v15  ;;  %4156 = vmatprep.mubr.msk.f32.mxu0 %vm4604_vm5, %v4605_v41 }
 0x282   :  { %4179 = vmatprep.mubr.msk.f32.mxu1 %vm4604_vm5, %v4605_v41  ;;  %v4593_v23 = vpop.eup %4592 }
 0x283   :  { %4522 = vmatpush3.bf16.msra.mxu0 %v4521_v60  ;;  %v4595_v20 = vpop.eup %4594 }
 0x284   :  { %4537 = vmatpush3.bf16.msra.mxu1 %v4536_v63  ;;  %4523 = vmatprep.subr.bf16.mxu0 %v4603_v15 }
 0x285   :  { %4538 = vmatprep.subr.bf16.mxu1 %v4603_v15 }
 0x287   :  { %4525 = vmatpush3.bf16.msra.mxu0 %v4524_v6 }
 0x288   :  { %4540 = vmatpush3.bf16.msra.mxu1 %v4539_v10  ;;  %4526 = vmatprep.subr.bf16.mxu0 %v4603_v15 }
 0x289   :  { %4541 = vmatprep.subr.bf16.mxu1 %v4603_v15 }
 0x28b   :  { %4528 = vmatpush3.bf16.msra.mxu0 %v4527_v13 }
 0x28c   :  { %4543 = vmatpush3.bf16.msra.mxu1 %v4542_v14  ;;  %4529 = vmatprep.subr.bf16.mxu0 %v4603_v15 }
 0x28d   :  { %4544 = vmatprep.subr.bf16.mxu1 %v4603_v15 }
 0x28f   :  { %4531 = vmatpush3.bf16.msra.mxu0 %v4530_v21 }
 0x290   :  { %4546 = vmatpush3.bf16.msra.mxu1 %v4545_v22  ;;  %4547 = vmatprep.subr.bf16.mxu0 %v4603_v15 }
 0x292   :  { %4157 = vmatmul.mubr.msk.f32.vlgmr.msra.gmra.mrb[48].mxu0 %vm1929_vm6, %v4593_v23 }
 0x293   :  { %4180 = vmatmul.mubr.msk.f32.vlgmr.msra.gmra.mrb[52].mxu1 %vm1929_vm6, %v4595_v20  ;;  %4196 = vmatprep.mubr.msk.f32.mxu0 %vm4604_vm5, %v4605_v41 }
 0x294   :  { %4549 = vmatpush3.bf16.msra.mxu0 %v4548_v37 }
 0x295   :  { %4550 = vmatprep.subr.bf16.mxu0 %v4603_v15 }
 0x298   :  { %4552 = vmatpush3.bf16.msra.mxu0 %v4551_v29 }
 0x299   :  { %4553 = vmatprep.subr.bf16.mxu0 %v4603_v15  ;;  %v3380_v15 = vld [vmem:[%s5816_s7] ss:$0 sm:$0xff] }
 0x29c   :  { %4555 = vmatpush3.bf16.msra.mxu0 %v4554_v31 }
 0x29d   :  { %4194 = vmatprep.subr.mxu0 %v4605_v41 }
 0x2a0   :  { %4195 = vmatpush3.msk.msra.mxu0 %vm2962_vm7, %v2950_v32 }
 0x351   :  { %v2688_v33 = vpop.f32.mrb[46].mxu0 }
 0x352   :  { %v4112_v34 = vpop.f32.mrb[47].mxu0  ;;  %v2761_v35 = vpop.f32.mrb[50].mxu1 }
 0x353   :  { %v2762_v36 = vadd.f32 %v2761_v35, %v2688_v33  ;;  %v4135_v38 = vpop.f32.mrb[51].mxu1 }
 0x365   :  { %v2845_v39 = vpop.f32.mrb[48].mxu0 }
 0x366   :  { %v2849_v40 = vadd.f32 %v2845_v39, %v2762_v36  ;;  %v4158_v42 = vpop.f32.mrb[49].mxu0  ;;  %v2930_v43 = vpop.f32.mrb[52].mxu1 }
 0x367   :  { %v4181_v41 = vpop.f32.mrb[53].mxu1 }
 0x368   :  { %v2934_v44 = vadd.f32 %v2930_v43, %v2849_v40 }
 0x36a   :  { %v2942_v45 = vadd.f32 %v3380_v15, %v2934_v44 }
 0x36c   :  { %4596 = vtanh.f32 %v2942_v45 }
 0x376   :  { %v4597_v46 = vpop.eup %4596 }
 0x377   :  { %4197 = vmatmul.mubr.msk.f32.vlgmr.msra.gmra.mrb[50].mxu0 %vm2958_vm8, %v4597_v46 }
 0x44a   :  { %v3032_v48 = vpop.f32.mrb[50].mxu0 }
 0x44b   :  { %v3033_v49 = vadd.f32 %v3381_v47, %v3032_v48  ;;  %v4198_v50 = vpop.f32.mrb[51].mxu0 }
 0x44d   :  { %v3037_v26 = vsel %vm3036_vm9, %v3033_v49, -inf }
 0x44e   :  { %3038 = vmax.xlane.f32.xlu0 %v3037_v26 }
 0x4db   :  { %v3039_v51 = vpop.xlane.xlu0 %3038 }
 0x4dc   :  { %v3040_v52 = vsub.f32 %v3033_v49, %v3039_v51 }
 0x4de   :  { %v3041_v53 = vmul.f32 1.442695, %v3040_v52 }
 0x4e0   :  { %4598 = vpow2.f32 %v3041_v53 }
 0x4ea   :  { %v4599_v54 = vpop.eup %4598 }
 0x4eb   :  { %v3043_v55 = vsel %vm3036_vm9, %v4599_v54, 0.0 }
 0x4ec   :  { %3044 = vadd.xlane.f32.xlu0 %v3043_v55 }
 0x579   :  { %v3045_v56 = vpop.xlane.xlu0 %3044 }
 0x57a   :  { %4600 = vlog2.f32 %v3045_v56 }
 0x584   :  { %v4601_v57 = vpop.eup %4600 }
 0x585   :  { %v3047_v58 = vmul.f32 0.6931472, %v4601_v57 }
 0x587   :  { %v3048_v59 = vsub.f32 %v3040_v52, %v3047_v58 }
 0x589   :  { %3049 = vst.msk [vmem:[%s5818_s9] sm:$0xff] %vm3036_vm9, %v3048_v59 }

</bundles_post_ra>
